<compile_context>
chip_gen: v6e
topology: v6e:2x2x1
jax: 0.10.0
libtpu: 0.0.40
codegen_flags: <defaults>
</compile_context>

<pallas_src>
import functools
import math

import jax
import jax.numpy as jnp
from jax import lax
from jax.experimental import pallas as pl
from jax.experimental.pallas import tpu as pltpu

EPS = 1e-6
NEG_INF = -1e9


# --------------------------------------------------------------------------
# tiling helpers
# --------------------------------------------------------------------------
def _vmem_budget_bytes():
    try:
        cap = pltpu.get_tpu_info().vmem_capacity_bytes
    except Exception:
        cap = 64 << 20  # conservative (v7x per-core VMEM)
    # Leave headroom below physical capacity for compiler scratch.
    return min((cap * 3) // 4, 96 << 20)


def _row_multiple(dtype):
    # sublane packing: f32 -> 8, bf16 -> 16, int8/fp8 -> 32
    return max(8, 32 // jnp.dtype(dtype).itemsize)


def _choose_row_tile(rows, mult, cap):
    """Largest row tile <= cap, multiple of `mult`, keeping >=2 grid steps so
    both v7x TensorCores get work when there are enough rows."""
    cap = max(mult, (cap // mult) * mult)
    if rows <= mult:
        return rows                      # full dim: always a legal block dim
    half = -(-rows // 2)                 # cdiv(rows, 2)
    half = -(-half // mult) * mult       # round up to `mult`
    return max(mult, min(cap, half))


def _choose_k_tile(k):
    for cand in (512, 256, 128):
        if k % cand == 0:
            return cand
    return k                             # full reduction dim: no partial-K garbage


def _choose_n_tile(n):
    for cand in (512, 256, 128):
        if n % cand == 0:
            return cand
    return n


# --------------------------------------------------------------------------
# LayerNormalization kernel  (torch: unbiased std, eps added to std)
# --------------------------------------------------------------------------
def layernorm_kernel(x_ref, gamma_ref, beta_ref, o_ref):
    x = x_ref[...].astype(jnp.float32)           # (tile_rows, F)
    g = gamma_ref[...].astype(jnp.float32)       # (1, F) -- loaded/cast once
    b = beta_ref[...].astype(jnp.float32)
    f = x.shape[-1]
    mean = jnp.mean(x, axis=-1, keepdims=True)
    d = x - mean
    # torch.std default: unbiased (divide by N-1)
    var = jnp.sum(d * d, axis=-1, keepdims=True) * (1.0 / (f - 1))
    # divide goes to the EUP slot (set approx=True for extra headroom if fused
    # with more VPU work later).
    inv = pl.reciprocal(jnp.sqrt(var) + EPS, approx=False)
    o_ref[...] = (g * (d * inv) + b).astype(o_ref.dtype)


def layernorm(x, gamma, beta):
    shape = x.shape
    feat = shape[-1]
    assert feat > 1, "LayerNormalization needs features > 1 (unbiased std)"
    rows = math.prod(shape[:-1])
    x2d = x.reshape(rows, feat)

    budget = _vmem_budget_bytes()
    mult = _row_multiple(x.dtype)
    # double-buffered in + out tiles + one f32 working copy
    per_row = (2 + 2 + 1) * feat * 4
    cap = max(mult, min(1024, budget // max(per_row, 1)))
    tile_rows = _choose_row_tile(rows, mult, cap)

    out2d = pl.pallas_call(
        layernorm_kernel,
        out_shape=jax.ShapeDtypeStruct((rows, feat), x.dtype),
        grid_spec=pltpu.PrefetchScalarGridSpec(
            num_scalar_prefetch=0,
            grid=(pl.cdiv(rows, tile_rows),),
            in_specs=[
                pl.BlockSpec((tile_rows, feat), lambda i: (i, 0)),
                pl.BlockSpec((1, feat), lambda i: (0, 0)),
                pl.BlockSpec((1, feat), lambda i: (0, 0)),
            ],
            out_specs=pl.BlockSpec((tile_rows, feat), lambda i: (i, 0)),
        ),
        compiler_params=pltpu.CompilerParams(
            dimension_semantics=("parallel",),
            vmem_limit_bytes=budget,
        ),
    )(x2d, gamma.reshape(1, feat), beta.reshape(1, feat))
    return out2d.reshape(shape)


# --------------------------------------------------------------------------
# Linear kernel: y = x @ w + b  (+ optional fused ReLU / residual add)
# --------------------------------------------------------------------------
def _linear_kernel(x_ref, w_ref, b_ref, *refs, activation, add_residual):
    if add_residual:
        res_ref, o_ref, acc_ref = refs
    else:
        o_ref, acc_ref = refs
        res_ref = None

    k = pl.program_id(2)

    @pl.when(k == 0)
    def _init():
        acc_ref[...] = jnp.zeros_like(acc_ref)

    acc_ref[...] += jnp.dot(x_ref[...], w_ref[...],
                            preferred_element_type=jnp.float32)

    @pl.when(k == pl.num_programs(2) - 1)
    def _finish():
        y = acc_ref[...] + b_ref[...].astype(jnp.float32)
        if activation == "relu":
            y = jnp.maximum(y, 0.0)
        if add_residual:
            y = y + res_ref[...].astype(jnp.float32)
        o_ref[...] = y.astype(o_ref.dtype)


def linear(x2d, w, b, *, residual=None, activation=None):
    """x2d: (M, K); w: (K, N) (already transposed from torch layout); b: (N,)."""
    m, k = x2d.shape
    kw, n = w.shape
    assert k == kw
    mult = _row_multiple(x2d.dtype)
    tm = _choose_row_tile(m, mult, 256)
    tn = _choose_n_tile(n)
    tk = _choose_k_tile(k)

    in_specs = [
        pl.BlockSpec((tm, tk), lambda i, j, kk: (i, kk)),
        pl.BlockSpec((tk, tn), lambda i, j, kk: (kk, j)),
        pl.BlockSpec((1, tn), lambda i, j, kk: (0, j)),
    ]
    args = [x2d, w, b.reshape(1, n)]
    if residual is not None:
        in_specs.append(pl.BlockSpec((tm, tn), lambda i, j, kk: (i, j)))
        args.append(residual)

    kernel = functools.partial(_linear_kernel, activation=activation,
                               add_residual=residual is not None)

    return pl.pallas_call(
        kernel,
        out_shape=jax.ShapeDtypeStruct((m, n), x2d.dtype),
        grid_spec=pltpu.PrefetchScalarGridSpec(
            num_scalar_prefetch=0,
            grid=(pl.cdiv(m, tm), pl.cdiv(n, tn), pl.cdiv(k, tk)),
            in_specs=in_specs,
            out_specs=pl.BlockSpec((tm, tn), lambda i, j, kk: (i, j)),
            scratch_shapes=[pltpu.VMEM((tm, tn), jnp.float32)],
        ),
        compiler_params=pltpu.CompilerParams(
            dimension_semantics=("parallel", "parallel", "arbitrary"),
            vmem_limit_bytes=_vmem_budget_bytes(),
        ),
    )(*args)


# --------------------------------------------------------------------------
# Attention kernel: per (batch, head) masked softmax(QK^T/sqrt(dk)) V
# --------------------------------------------------------------------------
def _attention_kernel(q_ref, k_ref, v_ref, mask_ref, o_ref, *, scale):
    q = q_ref[...].astype(jnp.float32)     # (Lq, dk)
    k = k_ref[...].astype(jnp.float32)     # (Lk, dk)
    v = v_ref[...].astype(jnp.float32)     # (Lk, dk)
    s = lax.dot_general(q, k, (((1,), (1,)), ((), ())),
                        preferred_element_type=jnp.float32) * scale
    s = jnp.where(mask_ref[...] == 0, NEG_INF, s)
    s = s - jnp.max(s, axis=-1, keepdims=True)
    p = jnp.exp(s)
    denom = jnp.sum(p, axis=-1, keepdims=True)
    p = p * pl.reciprocal(denom, approx=False)   # EUP divide
    o_ref[...] = jnp.dot(p, v, preferred_element_type=jnp.float32).astype(o_ref.dtype)


def multi_head_attention(q, k, v, mask, p, *, n_heads, residual):
    bq, lq, d = q.shape
    bk, lk, _ = k.shape
    dk = d // n_heads
    scale = 1.0 / math.sqrt(dk)

    q2 = linear(q.reshape(bq * lq, d), p["wq"], p["bq"])
    k2 = linear(k.reshape(bk * lk, d), p["wk"], p["bk"])
    v2 = linear(v.reshape(bk * lk, d), p["wv"], p["bv"])

    # head split (layout plumbing kept outside the kernels)
    qh = q2.reshape(bq, lq, n_heads, dk).transpose(0, 2, 1, 3)
    kh = k2.reshape(bk, lk, n_heads, dk).transpose(0, 2, 1, 3)
    vh = v2.reshape(bk, lk, n_heads, dk).transpose(0, 2, 1, 3)
    mask_b = jnp.broadcast_to(mask, (bq, n_heads, lq, lk)).astype(jnp.float32)

    ctx = pl.pallas_call(
        functools.partial(_attention_kernel, scale=scale),
        out_shape=jax.ShapeDtypeStruct((bq, n_heads, lq, dk), q.dtype),
        grid_spec=pltpu.PrefetchScalarGridSpec(
            num_scalar_prefetch=0,
            grid=(bq, n_heads),
            in_specs=[
                pl.BlockSpec((None, None, lq, dk), lambda b, h: (b, h, 0, 0)),
                pl.BlockSpec((None, None, lk, dk), lambda b, h: (b, h, 0, 0)),
                pl.BlockSpec((None, None, lk, dk), lambda b, h: (b, h, 0, 0)),
                pl.BlockSpec((None, None, lq, lk), lambda b, h: (b, h, 0, 0)),
            ],
            out_specs=pl.BlockSpec((None, None, lq, dk), lambda b, h: (b, h, 0, 0)),
        ),
        compiler_params=pltpu.CompilerParams(
            dimension_semantics=("parallel", "parallel"),
            vmem_limit_bytes=_vmem_budget_bytes(),
        ),
    )(qh, kh, vh, mask_b)

    ctx = ctx.transpose(0, 2, 1, 3).reshape(bq * lq, d)
    # out-proj with the residual add fused into the matmul epilogue
    out = linear(ctx, p["wo"], p["bo"], residual=residual.reshape(bq * lq, d))
    return out.reshape(bq, lq, d)


def feed_forward(x, p, *, residual):
    b, l, d = x.shape
    x2d = x.reshape(b * l, d)
    h = linear(x2d, p["w1"], p["b1"], activation="relu")
    out = linear(h, p["w2"], p["b2"], residual=residual.reshape(b * l, d))
    return out.reshape(b, l, d)


# --------------------------------------------------------------------------
# DecoderBlock forward
# --------------------------------------------------------------------------
@functools.partial(jax.jit, static_argnames=("n_heads",))
def decoder_block_forward(x, encoder_output, src_mask, tgt_mask, params, *, n_heads):
    h = layernorm(x, params["ln0_gamma"], params["ln0_beta"])
    x = multi_head_attention(h, h, h, tgt_mask, params["self_attn"],
                             n_heads=n_heads, residual=x)
    h = layernorm(x, params["ln1_gamma"], params["ln1_beta"])
    x = multi_head_attention(h, encoder_output, encoder_output, src_mask,
                             params["cross_attn"], n_heads=n_heads, residual=x)
    h = layernorm(x, params["ln2_gamma"], params["ln2_beta"])
    x = feed_forward(h, params["ffn"], residual=x)
    return x


# --------------------------------------------------------------------------
# pure-JAX reference (mirrors the PyTorch module, dropout = identity)
# --------------------------------------------------------------------------
def _ref_layernorm(x, g, b):
    mean = x.mean(-1, keepdims=True)
    std = jnp.std(x, axis=-1, keepdims=True, ddof=1)
    return g * (x - mean) / (std + EPS) + b


def _ref_mha(q, k, v, mask, p, n_heads):
    bq, lq, d = q.shape
    lk = k.shape[1]
    dk = d // n_heads
    qh = (q @ p["wq"] + p["bq"]).reshape(bq, lq, n_heads, dk).transpose(0, 2, 1, 3)
    kh = (k @ p["wk"] + p["bk"]).reshape(bq, lk, n_heads, dk).transpose(0, 2, 1, 3)
    vh = (v @ p["wv"] + p["bv"]).reshape(bq, lk, n_heads, dk).transpose(0, 2, 1, 3)
    scores = jnp.einsum("bhqd,bhkd->bhqk", qh, kh) / math.sqrt(dk)
    scores = jnp.where(mask == 0, NEG_INF, scores)
    attn = jax.nn.softmax(scores, axis=-1)
    ctx = jnp.einsum("bhqk,bhkd->bhqd", attn, vh).transpose(0, 2, 1, 3).reshape(bq, lq, d)
    return ctx @ p["wo"] + p["bo"]


def reference_forward(x, enc, src_mask, tgt_mask, params, n_heads):
    h = _ref_layernorm(x, params["ln0_gamma"], params["ln0_beta"])
    x = x + _ref_mha(h, h, h, tgt_mask, params["self_attn"], n_heads)
    h = _ref_layernorm(x, params["ln1_gamma"], params["ln1_beta"])
    x = x + _ref_mha(h, enc, enc, src_mask, params["cross_attn"], n_heads)
    h = _ref_layernorm(x, params["ln2_gamma"], params["ln2_beta"])
    f = params["ffn"]
    x = x + (jax.nn.relu(h @ f["w1"] + f["b1"]) @ f["w2"] + f["b2"])
    return x


if __name__ == "__main__":
    B, S_TGT, S_SRC = 2, 8, 8
    D_MODEL, N_HEADS, D_FF = 128, 4, 256   # lane-dense d_model (multiple of 128)

    key = jax.random.PRNGKey(0)
    ks = jax.random.split(key, 8)

    def lin_init(kw, kb, fan_in, fan_out):
        bound = 1.0 / math.sqrt(fan_in)
        w = jax.random.uniform(kw, (fan_in, fan_out), jnp.float32, -bound, bound)
        bb = jax.random.uniform(kb, (fan_out,), jnp.float32, -bound, bound)
        return w, bb

    def attn_params(kbase):
        kq, kk, kv, ko = jax.random.split(kbase, 4)
        wq, bq = lin_init(*jax.random.split(kq), D_MODEL, D_MODEL)
        wk, bk = lin_init(*jax.random.split(kk), D_MODEL, D_MODEL)
        wv, bv = lin_init(*jax.random.split(kv), D_MODEL, D_MODEL)
        wo, bo = lin_init(*jax.random.split(ko), D_MODEL, D_MODEL)
        return dict(wq=wq, bq=bq, wk=wk, bk=bk, wv=wv, bv=bv, wo=wo, bo=bo)

    w1, b1 = lin_init(*jax.random.split(ks[0]), D_MODEL, D_FF)
    w2, b2 = lin_init(*jax.random.split(ks[1]), D_FF, D_MODEL)

    params = {
        "ln0_gamma": jnp.ones((D_MODEL,), jnp.float32),
        "ln0_beta": jnp.zeros((D_MODEL,), jnp.float32),
        "ln1_gamma": jnp.ones((D_MODEL,), jnp.float32),
        "ln1_beta": jnp.zeros((D_MODEL,), jnp.float32),
        "ln2_gamma": jnp.ones((D_MODEL,), jnp.float32),
        "ln2_beta": jnp.zeros((D_MODEL,), jnp.float32),
        "self_attn": attn_params(ks[2]),
        "cross_attn": attn_params(ks[3]),
        "ffn": dict(w1=w1, b1=b1, w2=w2, b2=b2),
    }

    x = jax.random.normal(ks[4], (B, S_TGT, D_MODEL), jnp.float32)
    enc = jax.random.normal(ks[5], (B, S_SRC, D_MODEL), jnp.float32)
    tgt_mask = jnp.tril(jnp.ones((S_TGT, S_TGT), jnp.float32))[None, None]  # causal
    src_mask = jnp.ones((B, 1, 1, S_SRC), jnp.float32)

    out = decoder_block_forward(x, enc, src_mask, tgt_mask, params, n_heads=N_HEADS)
    out = jax.block_until_ready(out)

    ref = reference_forward(x, enc, src_mask, tgt_mask, params, N_HEADS)
    assert out.shape == (B, S_TGT, D_MODEL)
    assert jnp.allclose(out, ref, atol=2e-2, rtol=2e-2), float(jnp.max(jnp.abs(out - ref)))

    print("KERNEL_OK")
</pallas_src>

<mosaic_0001>
module attributes {stable_mosaic.version = 11 : i64} {
  func.func @_linear_kernel(%arg0: i32, %arg1: i32, %arg2: i32, %arg3: memref<8x128xf32, #tpu.memory_space<vmem>>, %arg4: memref<128x128xf32, #tpu.memory_space<vmem>>, %arg5: memref<1x128xf32, #tpu.memory_space<vmem>>, %arg6: memref<8x128xf32, #tpu.memory_space<vmem>>, %arg7: memref<8x128xf32, #tpu.memory_space<vmem>>) attributes {dimension_semantics = [#tpu.dimension_semantics<parallel>, #tpu.dimension_semantics<parallel>, #tpu.dimension_semantics<arbitrary>], iteration_bounds = array<i64: 2, 1, 1>, scalar_prefetch = 0 : i64, scratch_operands = 1 : i64, tpu.core_type = #tpu.core_type<tc>, window_params = [{transform_indices = @transform_0, window_bounds = array<i64: 8, 128>}, {transform_indices = @transform_1, window_bounds = array<i64: 128, 128>}, {transform_indices = @transform_2, window_bounds = array<i64: 1, 128>}, {transform_indices = @transform_3, window_bounds = array<i64: 8, 128>}]} {
    %c0_i32 = arith.constant 0 : i32
    %0 = arith.cmpi eq, %arg2, %c0_i32 : i32
    %1 = arith.extui %0 : i1 to i32
    %c0_i32_0 = arith.constant 0 : i32
    %2 = arith.cmpi ne, %1, %c0_i32_0 : i32
    scf.if %2 {
      %cst_10 = arith.constant 0.000000e+00 : f32
      %12 = vector.broadcast %cst_10 : f32 to vector<8x128xf32>
      %c0_11 = arith.constant 0 : index
      %c0_12 = arith.constant 0 : index
      %13 = vector.load %arg7[%c0_11, %c0_12] : memref<8x128xf32, #tpu.memory_space<vmem>>, vector<8x128xf32>
      tpu.vector_store %arg7[%c0_11, %c0_12], %12 {strides = array<i32>} : memref<8x128xf32, #tpu.memory_space<vmem>>, vector<8x128xf32>,
    } else {
    }
    %c0 = arith.constant 0 : index
    %c0_1 = arith.constant 0 : index
    %3 = vector.load %arg7[%c0, %c0_1] : memref<8x128xf32, #tpu.memory_space<vmem>>, vector<8x128xf32>
    %c0_2 = arith.constant 0 : index
    %c0_3 = arith.constant 0 : index
    %4 = vector.load %arg3[%c0_2, %c0_3] : memref<8x128xf32, #tpu.memory_space<vmem>>, vector<8x128xf32>
    %c0_4 = arith.constant 0 : index
    %c0_5 = arith.constant 0 : index
    %5 = vector.load %arg4[%c0_4, %c0_5] : memref<128x128xf32, #tpu.memory_space<vmem>>, vector<128x128xf32>
    %cst = arith.constant dense<0.000000e+00> : vector<8x128xf32>
    %6 = tpu.matmul %4, %5, %cst {dimension_numbers = #tpu.dot_dimension_numbers<[1], [0], [0], [1], [0, 0, 1, 1], [], []>} : vector<8x128xf32>, vector<128x128xf32>, vector<8x128xf32> -> vector<8x128xf32>
    %7 = arith.addf %3, %6 : vector<8x128xf32>
    %c0_6 = arith.constant 0 : index
    %c0_7 = arith.constant 0 : index
    %8 = vector.load %arg7[%c0_6, %c0_7] : memref<8x128xf32, #tpu.memory_space<vmem>>, vector<8x128xf32>
    tpu.vector_store %arg7[%c0_6, %c0_7], %7 {strides = array<i32>} : memref<8x128xf32, #tpu.memory_space<vmem>>, vector<8x128xf32>,
    %c0_i32_8 = arith.constant 0 : i32
    %9 = arith.cmpi eq, %arg2, %c0_i32_8 : i32
    %10 = arith.extui %9 : i1 to i32
    %c0_i32_9 = arith.constant 0 : i32
    %11 = arith.cmpi ne, %10, %c0_i32_9 : i32
    scf.if %11 {
      %c0_10 = arith.constant 0 : index
      %c0_11 = arith.constant 0 : index
      %12 = vector.load %arg7[%c0_10, %c0_11] : memref<8x128xf32, #tpu.memory_space<vmem>>, vector<8x128xf32>
      %c0_12 = arith.constant 0 : index
      %c0_13 = arith.constant 0 : index
      %13 = vector.load %arg5[%c0_12, %c0_13] : memref<1x128xf32, #tpu.memory_space<vmem>>, vector<1x128xf32>
      %14 = vector.broadcast %13 : vector<1x128xf32> to vector<8x128xf32>
      %15 = arith.addf %12, %14 : vector<8x128xf32>
      %c0_14 = arith.constant 0 : index
      %c0_15 = arith.constant 0 : index
      %16 = vector.load %arg6[%c0_14, %c0_15] : memref<8x128xf32, #tpu.memory_space<vmem>>, vector<8x128xf32>
      tpu.vector_store %arg6[%c0_14, %c0_15], %15 {strides = array<i32>} : memref<8x128xf32, #tpu.memory_space<vmem>>, vector<8x128xf32>,
    } else {
    }
    return
  }
  func.func @transform_0(%arg0: i32, %arg1: i32, %arg2: i32) -> (i32, i32) {
    %c0_i32 = arith.constant 0 : i32
    return %arg0, %arg2 : i32, i32
  }
  func.func @transform_1(%arg0: i32, %arg1: i32, %arg2: i32) -> (i32, i32) {
    %c0_i32 = arith.constant 0 : i32
    return %arg2, %arg1 : i32, i32
  }
  func.func @transform_2(%arg0: i32, %arg1: i32, %arg2: i32) -> (i32, i32) {
    %c0_i32 = arith.constant 0 : i32
    %c0_i32_0 = arith.constant 0 : i32
    return %c0_i32, %arg1 : i32, i32
  }
  func.func @transform_3(%arg0: i32, %arg1: i32, %arg2: i32) -> (i32, i32) {
    %c0_i32 = arith.constant 0 : i32
    return %arg0, %arg1 : i32, i32
  }
}

module attributes {stable_mosaic.version = 11 : i64} {
  func.func @_linear_kernel(%arg0: i32, %arg1: i32, %arg2: i32, %arg3: memref<8x128xf32, #tpu.memory_space<vmem>>, %arg4: memref<128x128xf32, #tpu.memory_space<vmem>>, %arg5: memref<1x128xf32, #tpu.memory_space<vmem>>, %arg6: memref<8x128xf32, #tpu.memory_space<vmem>>, %arg7: memref<8x128xf32, #tpu.memory_space<vmem>>) attributes {dimension_semantics = [#tpu.dimension_semantics<parallel>, #tpu.dimension_semantics<parallel>, #tpu.dimension_semantics<arbitrary>], iteration_bounds = array<i64: 2, 1, 1>, scalar_prefetch = 0 : i64, scratch_operands = 1 : i64, tpu.core_type = #tpu.core_type<tc>, window_params = [{transform_indices = @transform_0, window_bounds = array<i64: 8, 128>}, {transform_indices = @transform_1, window_bounds = array<i64: 128, 128>}, {transform_indices = @transform_2, window_bounds = array<i64: 1, 128>}, {transform_indices = @transform_3, window_bounds = array<i64: 8, 128>}]} {
    %c0_i32 = arith.constant 0 : i32
    %0 = arith.cmpi eq, %arg2, %c0_i32 : i32
    %1 = arith.extui %0 : i1 to i32
    %c0_i32_0 = arith.constant 0 : i32
    %2 = arith.cmpi ne, %1, %c0_i32_0 : i32
    scf.if %2 {
      %cst_10 = arith.constant 0.000000e+00 : f32
      %12 = vector.broadcast %cst_10 : f32 to vector<8x128xf32>
      %c0_11 = arith.constant 0 : index
      %c0_12 = arith.constant 0 : index
      %13 = vector.load %arg7[%c0_11, %c0_12] : memref<8x128xf32, #tpu.memory_space<vmem>>, vector<8x128xf32>
      tpu.vector_store %arg7[%c0_11, %c0_12], %12 {strides = array<i32>} : memref<8x128xf32, #tpu.memory_space<vmem>>, vector<8x128xf32>,
    } else {
    }
    %c0 = arith.constant 0 : index
    %c0_1 = arith.constant 0 : index
    %3 = vector.load %arg7[%c0, %c0_1] : memref<8x128xf32, #tpu.memory_space<vmem>>, vector<8x128xf32>
    %c0_2 = arith.constant 0 : index
    %c0_3 = arith.constant 0 : index
    %4 = vector.load %arg3[%c0_2, %c0_3] : memref<8x128xf32, #tpu.memory_space<vmem>>, vector<8x128xf32>
    %c0_4 = arith.constant 0 : index
    %c0_5 = arith.constant 0 : index
    %5 = vector.load %arg4[%c0_4, %c0_5] : memref<128x128xf32, #tpu.memory_space<vmem>>, vector<128x128xf32>
    %cst = arith.constant dense<0.000000e+00> : vector<8x128xf32>
    %6 = tpu.matmul %4, %5, %cst {dimension_numbers = #tpu.dot_dimension_numbers<[1], [0], [0], [1], [0, 0, 1, 1], [], []>} : vector<8x128xf32>, vector<128x128xf32>, vector<8x128xf32> -> vector<8x128xf32>
    %7 = arith.addf %3, %6 : vector<8x128xf32>
    %c0_6 = arith.constant 0 : index
    %c0_7 = arith.constant 0 : index
    %8 = vector.load %arg7[%c0_6, %c0_7] : memref<8x128xf32, #tpu.memory_space<vmem>>, vector<8x128xf32>
    tpu.vector_store %arg7[%c0_6, %c0_7], %7 {strides = array<i32>} : memref<8x128xf32, #tpu.memory_space<vmem>>, vector<8x128xf32>,
    %c0_i32_8 = arith.constant 0 : i32
    %9 = arith.cmpi eq, %arg2, %c0_i32_8 : i32
    %10 = arith.extui %9 : i1 to i32
    %c0_i32_9 = arith.constant 0 : i32
    %11 = arith.cmpi ne, %10, %c0_i32_9 : i32
    scf.if %11 {
      %c0_10 = arith.constant 0 : index
      %c0_11 = arith.constant 0 : index
      %12 = vector.load %arg7[%c0_10, %c0_11] : memref<8x128xf32, #tpu.memory_space<vmem>>, vector<8x128xf32>
      %c0_12 = arith.constant 0 : index
      %c0_13 = arith.constant 0 : index
      %13 = vector.load %arg5[%c0_12, %c0_13] : memref<1x128xf32, #tpu.memory_space<vmem>>, vector<1x128xf32>
      %14 = vector.broadcast %13 : vector<1x128xf32> to vector<8x128xf32>
      %15 = arith.addf %12, %14 : vector<8x128xf32>
      %c0_14 = arith.constant 0 : index
      %c0_15 = arith.constant 0 : index
      %16 = vector.load %arg6[%c0_14, %c0_15] : memref<8x128xf32, #tpu.memory_space<vmem>>, vector<8x128xf32>
      tpu.vector_store %arg6[%c0_14, %c0_15], %15 {strides = array<i32>} : memref<8x128xf32, #tpu.memory_space<vmem>>, vector<8x128xf32>,
    } else {
    }
    return
  }
  func.func @transform_0(%arg0: i32, %arg1: i32, %arg2: i32) -> (i32, i32) {
    %c0_i32 = arith.constant 0 : i32
    return %arg0, %arg2 : i32, i32
  }
  func.func @transform_1(%arg0: i32, %arg1: i32, %arg2: i32) -> (i32, i32) {
    %c0_i32 = arith.constant 0 : i32
    return %arg2, %arg1 : i32, i32
  }
  func.func @transform_2(%arg0: i32, %arg1: i32, %arg2: i32) -> (i32, i32) {
    %c0_i32 = arith.constant 0 : i32
    %c0_i32_0 = arith.constant 0 : i32
    return %c0_i32, %arg1 : i32, i32
  }
  func.func @transform_3(%arg0: i32, %arg1: i32, %arg2: i32) -> (i32, i32) {
    %c0_i32 = arith.constant 0 : i32
    return %arg0, %arg1 : i32, i32
  }
}

module attributes {stable_mosaic.version = 11 : i64} {
  func.func @layernorm_kernel(%arg0: i32, %arg1: memref<8x128xf32, #tpu.memory_space<vmem>>, %arg2: memref<1x128xf32, #tpu.memory_space<vmem>>, %arg3: memref<1x128xf32, #tpu.memory_space<vmem>>, %arg4: memref<8x128xf32, #tpu.memory_space<vmem>>) attributes {dimension_semantics = [#tpu.dimension_semantics<parallel>], iteration_bounds = array<i64: 2>, scalar_prefetch = 0 : i64, scratch_operands = 0 : i64, tpu.core_type = #tpu.core_type<tc>, window_params = [{transform_indices = @transform_0, window_bounds = array<i64: 8, 128>}, {pipeline_mode = #tpu.pipeline_mode<synchronous>, transform_indices = @transform_1, window_bounds = array<i64: 1, 128>}, {pipeline_mode = #tpu.pipeline_mode<synchronous>, transform_indices = @transform_2, window_bounds = array<i64: 1, 128>}, {transform_indices = @transform_3, window_bounds = array<i64: 8, 128>}]} {
    %c0 = arith.constant 0 : index
    %c0_0 = arith.constant 0 : index
    %0 = vector.load %arg1[%c0, %c0_0] : memref<8x128xf32, #tpu.memory_space<vmem>>, vector<8x128xf32>
    %c0_1 = arith.constant 0 : index
    %c0_2 = arith.constant 0 : index
    %1 = vector.load %arg2[%c0_1, %c0_2] : memref<1x128xf32, #tpu.memory_space<vmem>>, vector<1x128xf32>
    %c0_3 = arith.constant 0 : index
    %c0_4 = arith.constant 0 : index
    %2 = vector.load %arg3[%c0_3, %c0_4] : memref<1x128xf32, #tpu.memory_space<vmem>>, vector<1x128xf32>
    %cst = arith.constant dense<0.000000e+00> : vector<8xf32>
    %3 = vector.multi_reduction <add>, %0, %cst [1] : vector<8x128xf32> to vector<8xf32>
    %4 = vector.shape_cast %3 : vector<8xf32> to vector<8x1xf32>
    %cst_5 = arith.constant 1.280000e+02 : f32
    %5 = vector.broadcast %cst_5 : f32 to vector<8x1xf32>
    %6 = arith.divf %4, %5 : vector<8x1xf32>
    %7 = vector.broadcast %6 : vector<8x1xf32> to vector<8x128xf32>
    %8 = arith.subf %0, %7 : vector<8x128xf32>
    %9 = arith.mulf %8, %8 : vector<8x128xf32>
    %cst_6 = arith.constant dense<0.000000e+00> : vector<8xf32>
    %10 = vector.multi_reduction <add>, %9, %cst_6 [1] : vector<8x128xf32> to vector<8xf32>
    %11 = vector.shape_cast %10 : vector<8xf32> to vector<8x1xf32>
    %cst_7 = arith.constant 0.00787401571 : f32
    %12 = vector.broadcast %cst_7 : f32 to vector<8x1xf32>
    %13 = arith.mulf %11, %12 : vector<8x1xf32>
    %14 = math.sqrt %13 : vector<8x1xf32>
    %cst_8 = arith.constant 9.99999997E-7 : f32
    %15 = vector.broadcast %cst_8 : f32 to vector<8x1xf32>
    %16 = arith.addf %14, %15 : vector<8x1xf32>
    %17 = tpu.reciprocal %16 : vector<8x1xf32> -> vector<8x1xf32>
    %18 = vector.broadcast %17 : vector<8x1xf32> to vector<8x128xf32>
    %19 = arith.mulf %8, %18 : vector<8x128xf32>
    %20 = vector.broadcast %1 : vector<1x128xf32> to vector<8x128xf32>
    %21 = arith.mulf %20, %19 : vector<8x128xf32>
    %22 = vector.broadcast %2 : vector<1x128xf32> to vector<8x128xf32>
    %23 = arith.addf %21, %22 : vector<8x128xf32>
    %c0_9 = arith.constant 0 : index
    %c0_10 = arith.constant 0 : index
    %24 = vector.load %arg4[%c0_9, %c0_10] : memref<8x128xf32, #tpu.memory_space<vmem>>, vector<8x128xf32>
    tpu.vector_store %arg4[%c0_9, %c0_10], %23 {strides = array<i32>} : memref<8x128xf32, #tpu.memory_space<vmem>>, vector<8x128xf32>,
    return
  }
  func.func @transform_0(%arg0: i32) -> (i32, i32) {
    %c0_i32 = arith.constant 0 : i32
    %c0_i32_0 = arith.constant 0 : i32
    return %arg0, %c0_i32 : i32, i32
  }
  func.func @transform_1(%arg0: i32) -> (i32, i32) {
    %c0_i32 = arith.constant 0 : i32
    %c0_i32_0 = arith.constant 0 : i32
    %c0_i32_1 = arith.constant 0 : i32
    return %c0_i32, %c0_i32_0 : i32, i32
  }
  func.func @transform_2(%arg0: i32) -> (i32, i32) {
    %c0_i32 = arith.constant 0 : i32
    %c0_i32_0 = arith.constant 0 : i32
    %c0_i32_1 = arith.constant 0 : i32
    return %c0_i32, %c0_i32_0 : i32, i32
  }
  func.func @transform_3(%arg0: i32) -> (i32, i32) {
    %c0_i32 = arith.constant 0 : i32
    %c0_i32_0 = arith.constant 0 : i32
    return %arg0, %c0_i32 : i32, i32
  }
}

module attributes {stable_mosaic.version = 11 : i64} {
  func.func @_attention_kernel(%arg0: i32, %arg1: i32, %arg2: memref<1x1x8x32xf32, #tpu.memory_space<vmem>>, %arg3: memref<1x1x8x32xf32, #tpu.memory_space<vmem>>, %arg4: memref<1x1x8x32xf32, #tpu.memory_space<vmem>>, %arg5: memref<1x1x8x8xf32, #tpu.memory_space<vmem>>, %arg6: memref<1x1x8x32xf32, #tpu.memory_space<vmem>>) attributes {dimension_semantics = [#tpu.dimension_semantics<parallel>, #tpu.dimension_semantics<parallel>], iteration_bounds = array<i64: 2, 4>, scalar_prefetch = 0 : i64, scratch_operands = 0 : i64, tpu.core_type = #tpu.core_type<tc>, window_params = [{transform_indices = @transform_0, window_bounds = array<i64: 1, 1, 8, 32>}, {transform_indices = @transform_1, window_bounds = array<i64: 1, 1, 8, 32>}, {transform_indices = @transform_2, window_bounds = array<i64: 1, 1, 8, 32>}, {transform_indices = @transform_3, window_bounds = array<i64: 1, 1, 8, 8>}, {transform_indices = @transform_4, window_bounds = array<i64: 1, 1, 8, 32>}]} {
    %c0 = arith.constant 0 : index
    %c0_0 = arith.constant 0 : index
    %c0_1 = arith.constant 0 : index
    %c0_2 = arith.constant 0 : index
    %0 = vector.load %arg2[%c0, %c0_0, %c0_1, %c0_2] : memref<1x1x8x32xf32, #tpu.memory_space<vmem>>, vector<1x1x8x32xf32>
    %1 = vector.shape_cast %0 : vector<1x1x8x32xf32> to vector<8x32xf32>
    %c0_3 = arith.constant 0 : index
    %c0_4 = arith.constant 0 : index
    %c0_5 = arith.constant 0 : index
    %c0_6 = arith.constant 0 : index
    %2 = vector.load %arg3[%c0_3, %c0_4, %c0_5, %c0_6] : memref<1x1x8x32xf32, #tpu.memory_space<vmem>>, vector<1x1x8x32xf32>
    %3 = vector.shape_cast %2 : vector<1x1x8x32xf32> to vector<8x32xf32>
    %c0_7 = arith.constant 0 : index
    %c0_8 = arith.constant 0 : index
    %c0_9 = arith.constant 0 : index
    %c0_10 = arith.constant 0 : index
    %4 = vector.load %arg4[%c0_7, %c0_8, %c0_9, %c0_10] : memref<1x1x8x32xf32, #tpu.memory_space<vmem>>, vector<1x1x8x32xf32>
    %5 = vector.shape_cast %4 : vector<1x1x8x32xf32> to vector<8x32xf32>
    %cst = arith.constant dense<0.000000e+00> : vector<8x8xf32>
    %6 = tpu.matmul %1, %3, %cst {dimension_numbers = #tpu.dot_dimension_numbers<[1], [1], [0], [0], [0, 0, 1, 0], [], []>} : vector<8x32xf32>, vector<8x32xf32>, vector<8x8xf32> -> vector<8x8xf32>
    %cst_11 = arith.constant 0.176776692 : f32
    %7 = vector.broadcast %cst_11 : f32 to vector<8x8xf32>
    %8 = arith.mulf %6, %7 : vector<8x8xf32>
    %c0_12 = arith.constant 0 : index
    %c0_13 = arith.constant 0 : index
    %c0_14 = arith.constant 0 : index
    %c0_15 = arith.constant 0 : index
    %9 = vector.load %arg5[%c0_12, %c0_13, %c0_14, %c0_15] : memref<1x1x8x8xf32, #tpu.memory_space<vmem>>, vector<1x1x8x8xf32>
    %10 = vector.shape_cast %9 : vector<1x1x8x8xf32> to vector<8x8xf32>
    %cst_16 = arith.constant 0.000000e+00 : f32
    %11 = vector.broadcast %cst_16 : f32 to vector<8x8xf32>
    %12 = arith.cmpf oeq, %10, %11 : vector<8x8xf32>
    %cst_17 = arith.constant -1.000000e+09 : f32
    %13 = vector.broadcast %cst_17 : f32 to vector<8x8xf32>
    %14 = arith.select %12, %13, %8 : vector<8x8xi1>, vector<8x8xf32>
    %cst_18 = arith.constant dense<0xFF800000> : vector<8xf32>
    %15 = vector.multi_reduction <maximumf>, %14, %cst_18 [1] : vector<8x8xf32> to vector<8xf32>
    %16 = vector.shape_cast %15 : vector<8xf32> to vector<8x1xf32>
    %17 = vector.broadcast %16 : vector<8x1xf32> to vector<8x8xf32>
    %18 = arith.subf %14, %17 : vector<8x8xf32>
    %19 = math.exp %18 : vector<8x8xf32>
    %cst_19 = arith.constant dense<0.000000e+00> : vector<8xf32>
    %20 = vector.multi_reduction <add>, %19, %cst_19 [1] : vector<8x8xf32> to vector<8xf32>
    %21 = vector.shape_cast %20 : vector<8xf32> to vector<8x1xf32>
    %22 = tpu.reciprocal %21 : vector<8x1xf32> -> vector<8x1xf32>
    %23 = vector.broadcast %22 : vector<8x1xf32> to vector<8x8xf32>
    %24 = arith.mulf %19, %23 : vector<8x8xf32>
    %cst_20 = arith.constant dense<0.000000e+00> : vector<8x32xf32>
    %25 = tpu.matmul %24, %5, %cst_20 {dimension_numbers = #tpu.dot_dimension_numbers<[1], [0], [0], [1], [0, 0, 1, 1], [], []>} : vector<8x8xf32>, vector<8x32xf32>, vector<8x32xf32> -> vector<8x32xf32>
    %c0_21 = arith.constant 0 : index
    %c0_22 = arith.constant 0 : index
    %c0_23 = arith.constant 0 : index
    %c0_24 = arith.constant 0 : index
    %26 = vector.load %arg6[%c0_21, %c0_22, %c0_23, %c0_24] : memref<1x1x8x32xf32, #tpu.memory_space<vmem>>, vector<1x1x8x32xf32>
    %27 = vector.shape_cast %26 : vector<1x1x8x32xf32> to vector<8x32xf32>
    %28 = vector.shape_cast %25 : vector<8x32xf32> to vector<1x1x8x32xf32>
    tpu.vector_store %arg6[%c0_21, %c0_22, %c0_23, %c0_24], %28 {strides = array<i32>} : memref<1x1x8x32xf32, #tpu.memory_space<vmem>>, vector<1x1x8x32xf32>,
    return
  }
  func.func @transform_0(%arg0: i32, %arg1: i32) -> (i32, i32, i32, i32) {
    %c0_i32 = arith.constant 0 : i32
    %c0_i32_0 = arith.constant 0 : i32
    %c0_i32_1 = arith.constant 0 : i32
    return %arg0, %arg1, %c0_i32, %c0_i32_0 : i32, i32, i32, i32
  }
  func.func @transform_1(%arg0: i32, %arg1: i32) -> (i32, i32, i32, i32) {
    %c0_i32 = arith.constant 0 : i32
    %c0_i32_0 = arith.constant 0 : i32
    %c0_i32_1 = arith.constant 0 : i32
    return %arg0, %arg1, %c0_i32, %c0_i32_0 : i32, i32, i32, i32
  }
  func.func @transform_2(%arg0: i32, %arg1: i32) -> (i32, i32, i32, i32) {
    %c0_i32 = arith.constant 0 : i32
    %c0_i32_0 = arith.constant 0 : i32
    %c0_i32_1 = arith.constant 0 : i32
    return %arg0, %arg1, %c0_i32, %c0_i32_0 : i32, i32, i32, i32
  }
  func.func @transform_3(%arg0: i32, %arg1: i32) -> (i32, i32, i32, i32) {
    %c0_i32 = arith.constant 0 : i32
    %c0_i32_0 = arith.constant 0 : i32
    %c0_i32_1 = arith.constant 0 : i32
    return %arg0, %arg1, %c0_i32, %c0_i32_0 : i32, i32, i32, i32
  }
  func.func @transform_4(%arg0: i32, %arg1: i32) -> (i32, i32, i32, i32) {
    %c0_i32 = arith.constant 0 : i32
    %c0_i32_0 = arith.constant 0 : i32
    %c0_i32_1 = arith.constant 0 : i32
    return %arg0, %arg1, %c0_i32, %c0_i32_0 : i32, i32, i32, i32
  }
}

module attributes {stable_mosaic.version = 11 : i64} {
  func.func @_linear_kernel(%arg0: i32, %arg1: i32, %arg2: i32, %arg3: memref<8x128xf32, #tpu.memory_space<vmem>>, %arg4: memref<128x128xf32, #tpu.memory_space<vmem>>, %arg5: memref<1x128xf32, #tpu.memory_space<vmem>>, %arg6: memref<8x128xf32, #tpu.memory_space<vmem>>, %arg7: memref<8x128xf32, #tpu.memory_space<vmem>>, %arg8: memref<8x128xf32, #tpu.memory_space<vmem>>) attributes {dimension_semantics = [#tpu.dimension_semantics<parallel>, #tpu.dimension_semantics<parallel>, #tpu.dimension_semantics<arbitrary>], iteration_bounds = array<i64: 2, 1, 1>, scalar_prefetch = 0 : i64, scratch_operands = 1 : i64, tpu.core_type = #tpu.core_type<tc>, window_params = [{transform_indices = @transform_0, window_bounds = array<i64: 8, 128>}, {transform_indices = @transform_1, window_bounds = array<i64: 128, 128>}, {transform_indices = @transform_2, window_bounds = array<i64: 1, 128>}, {transform_indices = @transform_3, window_bounds = array<i64: 8, 128>}, {transform_indices = @transform_4, window_bounds = array<i64: 8, 128>}]} {
    %c0_i32 = arith.constant 0 : i32
    %0 = arith.cmpi eq, %arg2, %c0_i32 : i32
    %1 = arith.extui %0 : i1 to i32
    %c0_i32_0 = arith.constant 0 : i32
    %2 = arith.cmpi ne, %1, %c0_i32_0 : i32
    scf.if %2 {
      %cst_10 = arith.constant 0.000000e+00 : f32
      %12 = vector.broadcast %cst_10 : f32 to vector<8x128xf32>
      %c0_11 = arith.constant 0 : index
      %c0_12 = arith.constant 0 : index
      %13 = vector.load %arg8[%c0_11, %c0_12] : memref<8x128xf32, #tpu.memory_space<vmem>>, vector<8x128xf32>
      tpu.vector_store %arg8[%c0_11, %c0_12], %12 {strides = array<i32>} : memref<8x128xf32, #tpu.memory_space<vmem>>, vector<8x128xf32>,
    } else {
    }
    %c0 = arith.constant 0 : index
    %c0_1 = arith.constant 0 : index
    %3 = vector.load %arg8[%c0, %c0_1] : memref<8x128xf32, #tpu.memory_space<vmem>>, vector<8x128xf32>
    %c0_2 = arith.constant 0 : index
    %c0_3 = arith.constant 0 : index
    %4 = vector.load %arg3[%c0_2, %c0_3] : memref<8x128xf32, #tpu.memory_space<vmem>>, vector<8x128xf32>
    %c0_4 = arith.constant 0 : index
    %c0_5 = arith.constant 0 : index
    %5 = vector.load %arg4[%c0_4, %c0_5] : memref<128x128xf32, #tpu.memory_space<vmem>>, vector<128x128xf32>
    %cst = arith.constant dense<0.000000e+00> : vector<8x128xf32>
    %6 = tpu.matmul %4, %5, %cst {dimension_numbers = #tpu.dot_dimension_numbers<[1], [0], [0], [1], [0, 0, 1, 1], [], []>} : vector<8x128xf32>, vector<128x128xf32>, vector<8x128xf32> -> vector<8x128xf32>
    %7 = arith.addf %3, %6 : vector<8x128xf32>
    %c0_6 = arith.constant 0 : index
    %c0_7 = arith.constant 0 : index
    %8 = vector.load %arg8[%c0_6, %c0_7] : memref<8x128xf32, #tpu.memory_space<vmem>>, vector<8x128xf32>
    tpu.vector_store %arg8[%c0_6, %c0_7], %7 {strides = array<i32>} : memref<8x128xf32, #tpu.memory_space<vmem>>, vector<8x128xf32>,
    %c0_i32_8 = arith.constant 0 : i32
    %9 = arith.cmpi eq, %arg2, %c0_i32_8 : i32
    %10 = arith.extui %9 : i1 to i32
    %c0_i32_9 = arith.constant 0 : i32
    %11 = arith.cmpi ne, %10, %c0_i32_9 : i32
    scf.if %11 {
      %c0_10 = arith.constant 0 : index
      %c0_11 = arith.constant 0 : index
      %12 = vector.load %arg8[%c0_10, %c0_11] : memref<8x128xf32, #tpu.memory_space<vmem>>, vector<8x128xf32>
      %c0_12 = arith.constant 0 : index
      %c0_13 = arith.constant 0 : index
      %13 = vector.load %arg5[%c0_12, %c0_13] : memref<1x128xf32, #tpu.memory_space<vmem>>, vector<1x128xf32>
      %14 = vector.broadcast %13 : vector<1x128xf32> to vector<8x128xf32>
      %15 = arith.addf %12, %14 : vector<8x128xf32>
      %c0_14 = arith.constant 0 : index
      %c0_15 = arith.constant 0 : index
      %16 = vector.load %arg6[%c0_14, %c0_15] : memref<8x128xf32, #tpu.memory_space<vmem>>, vector<8x128xf32>
      %17 = arith.addf %15, %16 : vector<8x128xf32>
      %c0_16 = arith.constant 0 : index
      %c0_17 = arith.constant 0 : index
      %18 = vector.load %arg7[%c0_16, %c0_17] : memref<8x128xf32, #tpu.memory_space<vmem>>, vector<8x128xf32>
      tpu.vector_store %arg7[%c0_16, %c0_17], %17 {strides = array<i32>} : memref<8x128xf32, #tpu.memory_space<vmem>>, vector<8x128xf32>,
    } else {
    }
    return
  }
  func.func @transform_0(%arg0: i32, %arg1: i32, %arg2: i32) -> (i32, i32) {
    %c0_i32 = arith.constant 0 : i32
    return %arg0, %arg2 : i32, i32
  }
  func.func @transform_1(%arg0: i32, %arg1: i32, %arg2: i32) -> (i32, i32) {
    %c0_i32 = arith.constant 0 : i32
    return %arg2, %arg1 : i32, i32
  }
  func.func @transform_2(%arg0: i32, %arg1: i32, %arg2: i32) -> (i32, i32) {
    %c0_i32 = arith.constant 0 : i32
    %c0_i32_0 = arith.constant 0 : i32
    return %c0_i32, %arg1 : i32, i32
  }
  func.func @transform_3(%arg0: i32, %arg1: i32, %arg2: i32) -> (i32, i32) {
    %c0_i32 = arith.constant 0 : i32
    return %arg0, %arg1 : i32, i32
  }
  func.func @transform_4(%arg0: i32, %arg1: i32, %arg2: i32) -> (i32, i32) {
    %c0_i32 = arith.constant 0 : i32
    return %arg0, %arg1 : i32, i32
  }
}

module attributes {stable_mosaic.version = 11 : i64} {
  func.func @_linear_kernel(%arg0: i32, %arg1: i32, %arg2: i32, %arg3: memref<8x256xf32, #tpu.memory_space<vmem>>, %arg4: memref<256x128xf32, #tpu.memory_space<vmem>>, %arg5: memref<1x128xf32, #tpu.memory_space<vmem>>, %arg6: memref<8x128xf32, #tpu.memory_space<vmem>>, %arg7: memref<8x128xf32, #tpu.memory_space<vmem>>, %arg8: memref<8x128xf32, #tpu.memory_space<vmem>>) attributes {dimension_semantics = [#tpu.dimension_semantics<parallel>, #tpu.dimension_semantics<parallel>, #tpu.dimension_semantics<arbitrary>], iteration_bounds = array<i64: 2, 1, 1>, scalar_prefetch = 0 : i64, scratch_operands = 1 : i64, tpu.core_type = #tpu.core_type<tc>, window_params = [{transform_indices = @transform_0, window_bounds = array<i64: 8, 256>}, {transform_indices = @transform_1, window_bounds = array<i64: 256, 128>}, {transform_indices = @transform_2, window_bounds = array<i64: 1, 128>}, {transform_indices = @transform_3, window_bounds = array<i64: 8, 128>}, {transform_indices = @transform_4, window_bounds = array<i64: 8, 128>}]} {
    %c0_i32 = arith.constant 0 : i32
    %0 = arith.cmpi eq, %arg2, %c0_i32 : i32
    %1 = arith.extui %0 : i1 to i32
    %c0_i32_0 = arith.constant 0 : i32
    %2 = arith.cmpi ne, %1, %c0_i32_0 : i32
    scf.if %2 {
      %cst_10 = arith.constant 0.000000e+00 : f32
      %12 = vector.broadcast %cst_10 : f32 to vector<8x128xf32>
      %c0_11 = arith.constant 0 : index
      %c0_12 = arith.constant 0 : index
      %13 = vector.load %arg8[%c0_11, %c0_12] : memref<8x128xf32, #tpu.memory_space<vmem>>, vector<8x128xf32>
      tpu.vector_store %arg8[%c0_11, %c0_12], %12 {strides = array<i32>} : memref<8x128xf32, #tpu.memory_space<vmem>>, vector<8x128xf32>,
    } else {
    }
    %c0 = arith.constant 0 : index
    %c0_1 = arith.constant 0 : index
    %3 = vector.load %arg8[%c0, %c0_1] : memref<8x128xf32, #tpu.memory_space<vmem>>, vector<8x128xf32>
    %c0_2 = arith.constant 0 : index
    %c0_3 = arith.constant 0 : index
    %4 = vector.load %arg3[%c0_2, %c0_3] : memref<8x256xf32, #tpu.memory_space<vmem>>, vector<8x256xf32>
    %c0_4 = arith.constant 0 : index
    %c0_5 = arith.constant 0 : index
    %5 = vector.load %arg4[%c0_4, %c0_5] : memref<256x128xf32, #tpu.memory_space<vmem>>, vector<256x128xf32>
    %cst = arith.constant dense<0.000000e+00> : vector<8x128xf32>
    %6 = tpu.matmul %4, %5, %cst {dimension_numbers = #tpu.dot_dimension_numbers<[1], [0], [0], [1], [0, 0, 1, 1], [], []>} : vector<8x256xf32>, vector<256x128xf32>, vector<8x128xf32> -> vector<8x128xf32>
    %7 = arith.addf %3, %6 : vector<8x128xf32>
    %c0_6 = arith.constant 0 : index
    %c0_7 = arith.constant 0 : index
    %8 = vector.load %arg8[%c0_6, %c0_7] : memref<8x128xf32, #tpu.memory_space<vmem>>, vector<8x128xf32>
    tpu.vector_store %arg8[%c0_6, %c0_7], %7 {strides = array<i32>} : memref<8x128xf32, #tpu.memory_space<vmem>>, vector<8x128xf32>,
    %c0_i32_8 = arith.constant 0 : i32
    %9 = arith.cmpi eq, %arg2, %c0_i32_8 : i32
    %10 = arith.extui %9 : i1 to i32
    %c0_i32_9 = arith.constant 0 : i32
    %11 = arith.cmpi ne, %10, %c0_i32_9 : i32
    scf.if %11 {
      %c0_10 = arith.constant 0 : index
      %c0_11 = arith.constant 0 : index
      %12 = vector.load %arg8[%c0_10, %c0_11] : memref<8x128xf32, #tpu.memory_space<vmem>>, vector<8x128xf32>
      %c0_12 = arith.constant 0 : index
      %c0_13 = arith.constant 0 : index
      %13 = vector.load %arg5[%c0_12, %c0_13] : memref<1x128xf32, #tpu.memory_space<vmem>>, vector<1x128xf32>
      %14 = vector.broadcast %13 : vector<1x128xf32> to vector<8x128xf32>
      %15 = arith.addf %12, %14 : vector<8x128xf32>
      %c0_14 = arith.constant 0 : index
      %c0_15 = arith.constant 0 : index
      %16 = vector.load %arg6[%c0_14, %c0_15] : memref<8x128xf32, #tpu.memory_space<vmem>>, vector<8x128xf32>
      %17 = arith.addf %15, %16 : vector<8x128xf32>
      %c0_16 = arith.constant 0 : index
      %c0_17 = arith.constant 0 : index
      %18 = vector.load %arg7[%c0_16, %c0_17] : memref<8x128xf32, #tpu.memory_space<vmem>>, vector<8x128xf32>
      tpu.vector_store %arg7[%c0_16, %c0_17], %17 {strides = array<i32>} : memref<8x128xf32, #tpu.memory_space<vmem>>, vector<8x128xf32>,
    } else {
    }
    return
  }
  func.func @transform_0(%arg0: i32, %arg1: i32, %arg2: i32) -> (i32, i32) {
    %c0_i32 = arith.constant 0 : i32
    return %arg0, %arg2 : i32, i32
  }
  func.func @transform_1(%arg0: i32, %arg1: i32, %arg2: i32) -> (i32, i32) {
    %c0_i32 = arith.constant 0 : i32
    return %arg2, %arg1 : i32, i32
  }
  func.func @transform_2(%arg0: i32, %arg1: i32, %arg2: i32) -> (i32, i32) {
    %c0_i32 = arith.constant 0 : i32
    %c0_i32_0 = arith.constant 0 : i32
    return %c0_i32, %arg1 : i32, i32
  }
  func.func @transform_3(%arg0: i32, %arg1: i32, %arg2: i32) -> (i32, i32) {
    %c0_i32 = arith.constant 0 : i32
    return %arg0, %arg1 : i32, i32
  }
  func.func @transform_4(%arg0: i32, %arg1: i32, %arg2: i32) -> (i32, i32) {
    %c0_i32 = arith.constant 0 : i32
    return %arg0, %arg1 : i32, i32
  }
}

module attributes {stable_mosaic.version = 11 : i64} {
  func.func @_linear_kernel(%arg0: i32, %arg1: i32, %arg2: i32, %arg3: memref<8x128xf32, #tpu.memory_space<vmem>>, %arg4: memref<128x256xf32, #tpu.memory_space<vmem>>, %arg5: memref<1x256xf32, #tpu.memory_space<vmem>>, %arg6: memref<8x256xf32, #tpu.memory_space<vmem>>, %arg7: memref<8x256xf32, #tpu.memory_space<vmem>>) attributes {dimension_semantics = [#tpu.dimension_semantics<parallel>, #tpu.dimension_semantics<parallel>, #tpu.dimension_semantics<arbitrary>], iteration_bounds = array<i64: 2, 1, 1>, scalar_prefetch = 0 : i64, scratch_operands = 1 : i64, tpu.core_type = #tpu.core_type<tc>, window_params = [{transform_indices = @transform_0, window_bounds = array<i64: 8, 128>}, {transform_indices = @transform_1, window_bounds = array<i64: 128, 256>}, {transform_indices = @transform_2, window_bounds = array<i64: 1, 256>}, {transform_indices = @transform_3, window_bounds = array<i64: 8, 256>}]} {
    %c0_i32 = arith.constant 0 : i32
    %0 = arith.cmpi eq, %arg2, %c0_i32 : i32
    %1 = arith.extui %0 : i1 to i32
    %c0_i32_0 = arith.constant 0 : i32
    %2 = arith.cmpi ne, %1, %c0_i32_0 : i32
    scf.if %2 {
      %cst_10 = arith.constant 0.000000e+00 : f32
      %12 = vector.broadcast %cst_10 : f32 to vector<8x256xf32>
      %c0_11 = arith.constant 0 : index
      %c0_12 = arith.constant 0 : index
      %13 = vector.load %arg7[%c0_11, %c0_12] : memref<8x256xf32, #tpu.memory_space<vmem>>, vector<8x256xf32>
      tpu.vector_store %arg7[%c0_11, %c0_12], %12 {strides = array<i32>} : memref<8x256xf32, #tpu.memory_space<vmem>>, vector<8x256xf32>,
    } else {
    }
    %c0 = arith.constant 0 : index
    %c0_1 = arith.constant 0 : index
    %3 = vector.load %arg7[%c0, %c0_1] : memref<8x256xf32, #tpu.memory_space<vmem>>, vector<8x256xf32>
    %c0_2 = arith.constant 0 : index
    %c0_3 = arith.constant 0 : index
    %4 = vector.load %arg3[%c0_2, %c0_3] : memref<8x128xf32, #tpu.memory_space<vmem>>, vector<8x128xf32>
    %c0_4 = arith.constant 0 : index
    %c0_5 = arith.constant 0 : index
    %5 = vector.load %arg4[%c0_4, %c0_5] : memref<128x256xf32, #tpu.memory_space<vmem>>, vector<128x256xf32>
    %cst = arith.constant dense<0.000000e+00> : vector<8x256xf32>
    %6 = tpu.matmul %4, %5, %cst {dimension_numbers = #tpu.dot_dimension_numbers<[1], [0], [0], [1], [0, 0, 1, 1], [], []>} : vector<8x128xf32>, vector<128x256xf32>, vector<8x256xf32> -> vector<8x256xf32>
    %7 = arith.addf %3, %6 : vector<8x256xf32>
    %c0_6 = arith.constant 0 : index
    %c0_7 = arith.constant 0 : index
    %8 = vector.load %arg7[%c0_6, %c0_7] : memref<8x256xf32, #tpu.memory_space<vmem>>, vector<8x256xf32>
    tpu.vector_store %arg7[%c0_6, %c0_7], %7 {strides = array<i32>} : memref<8x256xf32, #tpu.memory_space<vmem>>, vector<8x256xf32>,
    %c0_i32_8 = arith.constant 0 : i32
    %9 = arith.cmpi eq, %arg2, %c0_i32_8 : i32
    %10 = arith.extui %9 : i1 to i32
    %c0_i32_9 = arith.constant 0 : i32
    %11 = arith.cmpi ne, %10, %c0_i32_9 : i32
    scf.if %11 {
      %c0_10 = arith.constant 0 : index
      %c0_11 = arith.constant 0 : index
      %12 = vector.load %arg7[%c0_10, %c0_11] : memref<8x256xf32, #tpu.memory_space<vmem>>, vector<8x256xf32>
      %c0_12 = arith.constant 0 : index
      %c0_13 = arith.constant 0 : index
      %13 = vector.load %arg5[%c0_12, %c0_13] : memref<1x256xf32, #tpu.memory_space<vmem>>, vector<1x256xf32>
      %14 = vector.broadcast %13 : vector<1x256xf32> to vector<8x256xf32>
      %15 = arith.addf %12, %14 : vector<8x256xf32>
      %cst_14 = arith.constant 0.000000e+00 : f32
      %16 = vector.broadcast %cst_14 : f32 to vector<8x256xf32>
      %17 = arith.maximumf %15, %16 : vector<8x256xf32>
      %c0_15 = arith.constant 0 : index
      %c0_16 = arith.constant 0 : index
      %18 = vector.load %arg6[%c0_15, %c0_16] : memref<8x256xf32, #tpu.memory_space<vmem>>, vector<8x256xf32>
      tpu.vector_store %arg6[%c0_15, %c0_16], %17 {strides = array<i32>} : memref<8x256xf32, #tpu.memory_space<vmem>>, vector<8x256xf32>,
    } else {
    }
    return
  }
  func.func @transform_0(%arg0: i32, %arg1: i32, %arg2: i32) -> (i32, i32) {
    %c0_i32 = arith.constant 0 : i32
    return %arg0, %arg2 : i32, i32
  }
  func.func @transform_1(%arg0: i32, %arg1: i32, %arg2: i32) -> (i32, i32) {
    %c0_i32 = arith.constant 0 : i32
    return %arg2, %arg1 : i32, i32
  }
  func.func @transform_2(%arg0: i32, %arg1: i32, %arg2: i32) -> (i32, i32) {
    %c0_i32 = arith.constant 0 : i32
    %c0_i32_0 = arith.constant 0 : i32
    return %c0_i32, %arg1 : i32, i32
  }
  func.func @transform_3(%arg0: i32, %arg1: i32, %arg2: i32) -> (i32, i32) {
    %c0_i32 = arith.constant 0 : i32
    return %arg0, %arg1 : i32, i32
  }
}

</mosaic_0001>

<bundles_post_ra>
// kernel: decoder_block_forward.17
= control target key start
LH: loop header
LB: loop body
LE: loop exit
PB: predicated region body
PF: predicated region fallthrough
CT: control target
= control target key end

     0   :  { %8 = vsyncpa [#allocation4], 0  ;;  %s642_s12 = smov 0   ;;  %s644_s13 = smov 0   ;;  %s704_s0 = inlined_call_operand.vmem [shape: f32[16,128], index: 0, kind: input, shape index: {}]   ;;  %s705_s1 = inlined_call_operand.hbm [shape: f32[128,128], index: 1, kind: input, shape index: {}]   ;;  %s706_s2 = inlined_call_operand.vmem [shape: f32[1,128], index: 2, kind: input, shape index: {}]   ;;  %s707_s3 = inlined_call_operand.vmem [shape: f32[16,128], index: 3, kind: output, shape index: {}]  }
   0x1   :  { %s646_s14 = smov 0  }
   0x2 LB: > { %s459_s15 = sadd.s32 4294967295, %s615_s14   ;;  %s33_s16 = sadd.s32 1, %s611_s13  ;;  %s615_s14 = sphi %s646_s14, %s14_s14   ;;  %s611_s13 = sphi %s644_s13, %s711_s13   ;;  %s607_s12 = sphi %s642_s12, %s710_s12  }
   0x3   : > { %p35_p0 = scmp.ge.s32.totalorder %s33_s16, 2  ;;  %p461_p1 = scmp.ge.s32.totalorder %s615_s14, 1 }
   0x4   : > { %p148_p2 = scmp.lt.s32.totalorder %s615_s14, 3  ;;  %p667_p4 = scmp.eq.s32.totalorder %s459_s15, 0 }
   0x5   : > { %s713_s16 = smov (%p35_p0, %s33_s16), 0  ;;  %s617_s19 = smov [#allocation3]  }
   0x6   : > { %p663_p3 = pnand %p461_p1, %p148_p2  ;;  %s164_s20 = sshll.u32 %s617_s19, 4  ;;  %s165_s20 = int_to_ptr.vmem [resolvable:$true] %s164_s20 }
   0x7   : > { %s574_s21 = scalar_lea.vmem %s165_s20, 2048  ;;  %p582_p11 = scmp.lt.s32.totalorder %s165_s20, %s165_s20 }
   0x8   : > { %p528_p5 = pneg %p663_p3  ;;  %p575_p8 = scmp.ne.s32.totalorder %s165_s20, %s574_s21 }
   0x9   : > { %p583_p12 = scmp.lt.s32.totalorder %s574_s21, %s574_s21 }
   0xa   : > { %p529_p6 = pnand %p667_p4, %p528_p5 }
   0xb   : > { %p584_p13 = por %p583_p12, %p582_p11 }
   0xc   : > { %p565_p7 = pneg %p529_p6 }
   0xe   : > { %p577_p9 = pnand %p575_p8, %p565_p7 }
  0x10   : > { %p578_p10 = pneg %p577_p9 }
  0x12   : > { %p585_p0 = pnand %p584_p13, %p578_p10 }
  0x14   : > { %588 = shalt.err (!%p585_p0)
}
  0x15   : > { %s618_s22 = smov 128   ;;  %s619_s23 = smov 8  }
  0x16   : > { %531 = dma.hbm_to_vmem [thread:$0]  (!%p529_p6), %s705_s1, 2048, %s165_s20, [#allocation4], %s618_s22, %s618_s22, %s619_s23  }
  0x17   : > { %196 = sbr.rel (%p663_p3) target bundleno = 258 (0x102), region = 32 }
  0x1c   : > { %602 = dma.done.wait (%p667_p4), [#allocation4], 2048  }
  0x1d   : > { %604 = vsyncadd (%p667_p4), [#allocation4], 4294965248  ;;  %v620_v0 = vmov 0.0   ;;  %vm621_vm0 = vmmov 0   ;;  %v267_v1 = vld [vmem:[#allocation3 + $0x78] sm:$0xff]  ;;  %v266_v2 = vld [vmem:[#allocation3 + $0x70] sm:$0xff] }
  0x1e   : > { %489 = vmatprep.subr.mxu0 %v620_v0  ;;  %521 = vmatprep.mubr.msk.f32.mxu0 %vm621_vm0, %v620_v0  ;;  %v265_v3 = vld [vmem:[#allocation3 + $0x68] sm:$0xff]  ;;  %v264_v4 = vld [vmem:[#allocation3 + $0x60] sm:$0xff]  ;;  %v263_v5 = vld [vmem:[#allocation3 + $0x58] sm:$0xff]  ;;  %p227_p1 = scmp.lt.s32.totalorder %s607_s12, 1 }
  0x1f   : > { %490 = vmatpush3.msra.mxu0 %v267_v1  ;;  %v262_v6 = vld [vmem:[#allocation3 + $0x50] sm:$0xff]  ;;  %v261_v7 = vld [vmem:[#allocation3 + $0x48] sm:$0xff]  ;;  %v260_v8 = vld [vmem:[#allocation3 + $0x40] sm:$0xff] }
  0x20   : > { %491 = vmatprep.subr.mxu0 %v620_v0  ;;  %v259_v9 = vld [vmem:[#allocation3 + $0x38] sm:$0xff]  ;;  %v258_v10 = vld [vmem:[#allocation3 + $0x30] sm:$0xff]  ;;  %v257_v11 = vld [vmem:[#allocation3 + $0x28] sm:$0xff]  ;;  %s715_s12 = smov (!%p227_p1, %s607_s12), 1 }
  0x21   : > { %492 = vmatpush3.msra.mxu0 %v266_v2  ;;  %v256_v12 = vld [vmem:[#allocation3 + $0x20] sm:$0xff]  ;;  %v255_v13 = vld [vmem:[#allocation3 + $0x18] sm:$0xff]  ;;  %s467_s26 = sshll.u32 %s715_s12, 3  ;;  %v254_v14 = vld [vmem:[#allocation3 + $0x10] sm:$0xff] }
  0x22   : > { %493 = vmatprep.subr.mxu0 %v620_v0  ;;  %v253_v15 = vld [vmem:[#allocation3 + $0x8] sm:$0xff]  ;;  %s233_s29 = scalar_lea.vmem %s704_s0, %s467_s26  ;;  %v252_v16 = vld [vmem:[#allocation3] sm:$0xff]  ;;  %s244_s7 = scalar_lea.vmem %s707_s3, %s467_s26 }
  0x23   : > { %494 = vmatpush3.msra.mxu0 %v265_v3  ;;  %v251_v17 = vld [vmem:[%s233_s29] sm:$0xff] }
  0x24   : > { %495 = vmatprep.subr.mxu0 %v620_v0  ;;  %v469_v18 = vld [vmem:[%s706_s2] ss:$0 sm:$0xff] }
  0x25   : > { %496 = vmatpush3.msra.mxu0 %v264_v4 }
  0x26   : > { %497 = vmatprep.subr.mxu0 %v620_v0 }
  0x27   : > { %498 = vmatpush3.msra.mxu0 %v263_v5 }
  0x28   : > { %499 = vmatprep.subr.mxu0 %v620_v0 }
  0x29   : > { %500 = vmatpush3.msra.mxu0 %v262_v6 }
  0x2a   : > { %501 = vmatprep.subr.mxu0 %v620_v0 }
  0x2b   : > { %502 = vmatpush3.msra.mxu0 %v261_v7 }
  0x2c   : > { %503 = vmatprep.subr.mxu0 %v620_v0 }
  0x2d   : > { %504 = vmatpush3.msra.mxu0 %v260_v8 }
  0x2e   : > { %505 = vmatprep.subr.mxu0 %v620_v0 }
  0x2f   : > { %506 = vmatpush3.msra.mxu0 %v259_v9 }
  0x30   : > { %507 = vmatprep.subr.mxu0 %v620_v0 }
  0x31   : > { %508 = vmatpush3.msra.mxu0 %v258_v10 }
  0x32   : > { %509 = vmatprep.subr.mxu0 %v620_v0 }
  0x33   : > { %510 = vmatpush3.msra.mxu0 %v257_v11 }
  0x34   : > { %511 = vmatprep.subr.mxu0 %v620_v0 }
  0x35   : > { %512 = vmatpush3.msra.mxu0 %v256_v12 }
  0x36   : > { %513 = vmatprep.subr.mxu0 %v620_v0 }
  0x37   : > { %514 = vmatpush3.msra.mxu0 %v255_v13 }
  0x38   : > { %515 = vmatprep.subr.mxu0 %v620_v0 }
  0x39   : > { %516 = vmatpush3.msra.mxu0 %v254_v14 }
  0x3a   : > { %517 = vmatprep.subr.mxu0 %v620_v0 }
  0x3b   : > { %518 = vmatpush3.msra.mxu0 %v253_v15 }
  0x3c   : > { %519 = vmatprep.subr.mxu0 %v620_v0 }
  0x3d   : > { %520 = vmatpush3.msra.mxu0 %v252_v16 }
  0x3e   : > { %522 = vmatmul.mubr.f32.vlgmr.msra.gmra.mxu0 %v251_v17 }
  0xfe   : > { %v334_v19 = vpop.f32.mrf.mxu0 }
  0xff   : > { %v351_v20 = vadd.f32 %v469_v18, %v334_v19 }
 0x100   : > { %v523_v21 = vpop.f32.mrf.mxu0 }
 0x101   : > { %352 = vst [vmem:[%s244_s7] sm:$0xff] %v351_v20 }
 0x102 PF: > { %s14_s14 = sadd.s32 1, %s615_s14   ;;  %s710_s12 = smov %s611_s13 }
 0x103   : > { %p11_p2 = scmp.ge.s32.totalorder %s14_s14, 4   ;;  %s711_s13 = smov %s713_s16 }
 0x105   :  { %13 = sbr.rel (!%p11_p2) target bundleno = 2 (0x2), region = 79 }
 0x10a   :  { %378 = vsyncpa [#allocation4], 1 }
 0x10b   :  { %380 = vsyncpa [#allocation4 + $0x1], 1 }

// kernel: decoder_block_forward.15
= control target key start
LH: loop header
LB: loop body
LE: loop exit
PB: predicated region body
PF: predicated region fallthrough
CT: control target
= control target key end

     0   :  { %s307_s12 = smov 0   ;;  %s330_s0 = inlined_call_operand.vmem [shape: f32[16,128], index: 0, kind: input, shape index: {}]   ;;  %s331_s1 = inlined_call_operand.vmem [shape: f32[1,128], index: 1, kind: input, shape index: {}]   ;;  %s332_s2 = inlined_call_operand.vmem [shape: f32[1,128], index: 2, kind: input, shape index: {}]   ;;  %s333_s3 = inlined_call_operand.vmem [shape: f32[16,128], index: 3, kind: output, shape index: {}]  }
   0x1 LB: > { %s256_s13 = sadd.s32 4294967295, %s285_s12   ;;  %p260_p0 = scmp.ge.s32.totalorder %s285_s12, 1  ;;  %s285_s12 = sphi %s307_s12, %s13_s12  }
   0x2   : > { %p136_p1 = scmp.lt.s32.totalorder %s285_s12, 3 }
   0x4   : > { %p137_p2 = pnand %p260_p0, %p136_p1 }
   0x5   : > { %p158_p3 = scmp.lt.s32.totalorder (!%p137_p2), %s256_s13, 1 }
   0x6   : > { %140 = sbr.rel (%p137_p2) target bundleno = 340 (0x154), region = 32 }
   0xb   : > { %s335_s13 = smov (!%p158_p3, %s256_s13), 1  ;;  %v263_v14 = vld [vmem:[%s331_s1] ss:$0 sm:$0xff] }
   0xc   : > { %s261_s14 = sshll.u32 %s335_s13, 3  ;;  %v264_v16 = vld [vmem:[%s332_s2] ss:$0 sm:$0xff] }
   0xd   : > { %s161_s17 = scalar_lea.vmem %s330_s0, %s261_s14  ;;  %s165_s24 = scalar_lea.vmem %s333_s3, %s261_s14 }
   0xe   : > { %v166_v0 = vld [vmem:[%s161_s17] sm:$0xff] }
   0xf   : > { %169 = vadd.xlane.f32.xlu0 %v166_v0 }
  0x98   : > { %v170_v1 = vpop.xlane.xlu0 %169 }
  0x99   : > { %v172_v2 = vmul.f32 0.0078125, %v170_v1 }
  0x9b   : > { %v173_v3 = vsub.f32 %v166_v0, %v172_v2 }
  0x9d   : > { %v174_v4 = vmul.f32 %v173_v3, %v173_v3 }
  0x9f   : > { %175 = vadd.xlane.f32.xlu0 %v174_v4 }
 0x128   : > { %v176_v5 = vpop.xlane.xlu0 %175 }
 0x129   : > { %v177_v6 = vmul.f32 0.007874016, %v176_v5 }
 0x12b   : > { %275 = vrsqrt.f32 %v177_v6  ;;  %vm180_vm0 = vcmp.eq.f32.partialorder %v177_v6, inf  ;;  %v183_v9 = vand.u32 2147483648, %v177_v6  ;;  %vm182_vm1 = vcmp.eq.f32.partialorder %v177_v6, 0.0 }
 0x138   : > { %v276_v7 = vpop.eup %275 }
 0x139   : > { %v179_v8 = vmul.f32 %v276_v7, %v177_v6 }
 0x13b   : > { %v181_v10 = vsel %vm180_vm0, %v177_v6, %v179_v8 }
 0x13c   : > { %v184_v11 = vsel %vm182_vm1, %v183_v9, %v181_v10 }
 0x13d   : > { %v185_v12 = vadd.f32 1e-06, %v184_v11 }
 0x13f   : > { %277 = vrcp.f32 %v185_v12 }
 0x14c   : > { %v278_v13 = vpop.eup %277 }
 0x14d   : > { %v187_v15 = vmul.f32 %v278_v13, %v173_v3 }
 0x14f   : > { %v194_v17 = vmul.f32 %v263_v14, %v187_v15 }
 0x151   : > { %v201_v18 = vadd.f32 %v264_v16, %v194_v17 }
 0x153   : > { %202 = vst [vmem:[%s165_s24] sm:$0xff] %v201_v18 }
 0x154 PF: > { %s13_s12 = sadd.s32 1, %s285_s12  }
 0x155   : > { %p10_p4 = scmp.ge.s32.totalorder %s13_s12, 4  }
 0x157   :  { %12 = sbr.rel (!%p10_p4) target bundleno = 1 (0x1), region = 62 }

// kernel: decoder_block_forward.18
= control target key start
LH: loop header
LB: loop body
LE: loop exit
PB: predicated region body
PF: predicated region fallthrough
CT: control target
= control target key end

     0   :  { %s603_s12 = smov 0   ;;  %s605_s13 = smov 0   ;;  %s691_s0 = inlined_call_operand.vmem [shape: f32[16,128], index: 0, kind: input, shape index: {}]   ;;  %s692_s1 = inlined_call_operand.vmem [shape: f32[128,128], index: 1, kind: input, shape index: {}]   ;;  %s693_s2 = inlined_call_operand.vmem [shape: f32[1,128], index: 2, kind: input, shape index: {}]   ;;  %s694_s3 = inlined_call_operand.vmem [shape: f32[16,128], index: 3, kind: output, shape index: {}]  }
   0x1   :  { %s607_s14 = smov 0  }
   0x2 LB: > { %s32_s15 = sadd.s32 1, %s575_s13  ;;  %p473_p0 = scmp.ge.s32.totalorder %s579_s14, 1  ;;  %s579_s14 = sphi %s607_s14, %s13_s14   ;;  %s575_s13 = sphi %s605_s13, %s696_s13   ;;  %s571_s12 = sphi %s603_s12, %s695_s12  }
   0x3   : > { %p34_p1 = scmp.ge.s32.totalorder %s32_s15, 2  ;;  %p186_p2 = scmp.lt.s32.totalorder %s579_s14, 3 }
   0x5   : > { %s698_s15 = smov (%p34_p1, %s32_s15), 0  ;;  %p187_p3 = pnand %p473_p0, %p186_p2 }
   0x6   : > { %p225_p4 = scmp.lt.s32.totalorder (!%p187_p3), %s571_s12, 1 }
   0x7   : > { %190 = sbr.rel (%p187_p3) target bundleno = 241 (0xf1), region = 32 }
   0xc   : > { %v273_v0 = vld [vmem:[%s692_s1 + $0x78] sm:$0xff]  ;;  %v581_v1 = vmov 0.0   ;;  %v272_v2 = vld [vmem:[%s692_s1 + $0x70] sm:$0xff]  ;;  %vm582_vm0 = vmmov 0   ;;  %v271_v3 = vld [vmem:[%s692_s1 + $0x68] sm:$0xff]  ;;  %s700_s12 = smov (!%p225_p4, %s571_s12), 1 }
   0xd   : > { %496 = vmatprep.subr.mxu0 %v581_v1  ;;  %528 = vmatprep.mubr.msk.f32.mxu0 %vm582_vm0, %v581_v1  ;;  %v270_v4 = vld [vmem:[%s692_s1 + $0x60] sm:$0xff]  ;;  %v269_v5 = vld [vmem:[%s692_s1 + $0x58] sm:$0xff]  ;;  %v268_v6 = vld [vmem:[%s692_s1 + $0x50] sm:$0xff]  ;;  %s474_s19 = sshll.u32 %s700_s12, 3 }
   0xe   : > { %497 = vmatpush3.msra.mxu0 %v273_v0  ;;  %v267_v7 = vld [vmem:[%s692_s1 + $0x48] sm:$0xff]  ;;  %v266_v8 = vld [vmem:[%s692_s1 + $0x40] sm:$0xff]  ;;  %v265_v9 = vld [vmem:[%s692_s1 + $0x38] sm:$0xff]  ;;  %s231_s26 = scalar_lea.vmem %s691_s0, %s474_s19  ;;  %s250_s5 = scalar_lea.vmem %s694_s3, %s474_s19 }
   0xf   : > { %498 = vmatprep.subr.mxu0 %v581_v1  ;;  %v264_v10 = vld [vmem:[%s692_s1 + $0x30] sm:$0xff]  ;;  %v263_v11 = vld [vmem:[%s692_s1 + $0x28] sm:$0xff]  ;;  %v262_v12 = vld [vmem:[%s692_s1 + $0x20] sm:$0xff] }
  0x10   : > { %499 = vmatpush3.msra.mxu0 %v272_v2  ;;  %v261_v13 = vld [vmem:[%s692_s1 + $0x18] sm:$0xff]  ;;  %v260_v14 = vld [vmem:[%s692_s1 + $0x10] sm:$0xff]  ;;  %v259_v15 = vld [vmem:[%s692_s1 + $0x8] sm:$0xff] }
  0x11   : > { %500 = vmatprep.subr.mxu0 %v581_v1  ;;  %v258_v16 = vld [vmem:[%s692_s1] sm:$0xff] }
  0x12   : > { %501 = vmatpush3.msra.mxu0 %v271_v3  ;;  %v257_v17 = vld [vmem:[%s231_s26] sm:$0xff] }
  0x13   : > { %502 = vmatprep.subr.mxu0 %v581_v1  ;;  %v476_v18 = vld [vmem:[%s693_s2] ss:$0 sm:$0xff] }
  0x14   : > { %503 = vmatpush3.msra.mxu0 %v270_v4 }
  0x15   : > { %504 = vmatprep.subr.mxu0 %v581_v1 }
  0x16   : > { %505 = vmatpush3.msra.mxu0 %v269_v5 }
  0x17   : > { %506 = vmatprep.subr.mxu0 %v581_v1 }
  0x18   : > { %507 = vmatpush3.msra.mxu0 %v268_v6 }
  0x19   : > { %508 = vmatprep.subr.mxu0 %v581_v1 }
  0x1a   : > { %509 = vmatpush3.msra.mxu0 %v267_v7 }
  0x1b   : > { %510 = vmatprep.subr.mxu0 %v581_v1 }
  0x1c   : > { %511 = vmatpush3.msra.mxu0 %v266_v8 }
  0x1d   : > { %512 = vmatprep.subr.mxu0 %v581_v1 }
  0x1e   : > { %513 = vmatpush3.msra.mxu0 %v265_v9 }
  0x1f   : > { %514 = vmatprep.subr.mxu0 %v581_v1 }
  0x20   : > { %515 = vmatpush3.msra.mxu0 %v264_v10 }
  0x21   : > { %516 = vmatprep.subr.mxu0 %v581_v1 }
  0x22   : > { %517 = vmatpush3.msra.mxu0 %v263_v11 }
  0x23   : > { %518 = vmatprep.subr.mxu0 %v581_v1 }
  0x24   : > { %519 = vmatpush3.msra.mxu0 %v262_v12 }
  0x25   : > { %520 = vmatprep.subr.mxu0 %v581_v1 }
  0x26   : > { %521 = vmatpush3.msra.mxu0 %v261_v13 }
  0x27   : > { %522 = vmatprep.subr.mxu0 %v581_v1 }
  0x28   : > { %523 = vmatpush3.msra.mxu0 %v260_v14 }
  0x29   : > { %524 = vmatprep.subr.mxu0 %v581_v1 }
  0x2a   : > { %525 = vmatpush3.msra.mxu0 %v259_v15 }
  0x2b   : > { %526 = vmatprep.subr.mxu0 %v581_v1 }
  0x2c   : > { %527 = vmatpush3.msra.mxu0 %v258_v16 }
  0x2d   : > { %529 = vmatmul.mubr.f32.vlgmr.msra.gmra.mxu0 %v257_v17 }
  0xed   : > { %v340_v19 = vpop.f32.mrf.mxu0 }
  0xee   : > { %v357_v20 = vadd.f32 %v476_v18, %v340_v19 }
  0xef   : > { %v530_v21 = vpop.f32.mrf.mxu0 }
  0xf0   : > { %358 = vst [vmem:[%s250_s5] sm:$0xff] %v357_v20 }
  0xf1 PF: > { %s13_s14 = sadd.s32 1, %s579_s14   ;;  %s695_s12 = smov %s575_s13 }
  0xf2   : > { %p10_p5 = scmp.ge.s32.totalorder %s13_s14, 4   ;;  %s696_s13 = smov %s698_s15 }
  0xf4   :  { %12 = sbr.rel (!%p10_p5) target bundleno = 2 (0x2), region = 76 }

// kernel: decoder_block_forward.19
= control target key start
LH: loop header
LB: loop body
LE: loop exit
PB: predicated region body
PF: predicated region fallthrough
CT: control target
= control target key end

     0   :  { %s779_s15 = smov 0   ;;  %s781_s16 = smov 0   ;;  %s852_s0 = inlined_call_operand.vmem [shape: f32[2,4,8,32], index: 0, kind: input, shape index: {}]   ;;  %s853_s1 = inlined_call_operand.vmem [shape: f32[2,4,8,32], index: 1, kind: input, shape index: {}]   ;;  %s854_s2 = inlined_call_operand.vmem [shape: f32[2,4,8,32], index: 2, kind: input, shape index: {}]   ;;  %s855_s3 = inlined_call_operand.vmem [shape: f32[2,4,8,8], index: 3, kind: input, shape index: {}]   ;;  %s856_s4 = inlined_call_operand.vmem [shape: f32[2,4,8,32], index: 4, kind: output, shape index: {}]  }
   0x1   :  { %s783_s17 = smov 0   ;;  %s785_s18 = smov 0  }
   0x2   :  { %s787_s19 = smov 0  }
   0x3 LB: > { %s23_s20 = sadd.s32 1, %s742_s17  ;;  %s26_s21 = sadd.s32 1, %s746_s18  ;;  %s750_s19 = sphi %s787_s19, %s14_s19   ;;  %s746_s18 = sphi %s785_s18, %s860_s18   ;;  %s742_s17 = sphi %s783_s17, %s859_s17   ;;  %s738_s16 = sphi %s781_s16, %s858_s16   ;;  %s734_s15 = sphi %s779_s15, %s857_s15  }
   0x4   : > { %p24_p0 = scmp.ge.s32.totalorder %s23_s20, 4  ;;  %p636_p1 = scmp.ge.s32.totalorder %s750_s19, 1 }
   0x5   : > { %p226_p2 = scmp.lt.s32.totalorder %s750_s19, 9 }
   0x6   : > { %s862_s20 = smov (%p24_p0, %s23_s20), 0  ;;  %s864_s21 = smov (!%p24_p0, %s26_s21), %s746_s18 }
   0x7   : > { %p227_p3 = pnand %p636_p1, %p226_p2  ;;  %p28_p4 = scmp.ge.s32.totalorder %s864_s21, 2 }
   0x8   : > { %p282_p5 = scmp.lt.s32.totalorder (!%p227_p3), %s738_s16, 1  ;;  %p284_p6 = scmp.lt.s32.totalorder (!%p227_p3), %s734_s15, 3 }
   0x9   : > { %s866_s21 = smov (%p28_p4, %s864_s21), 0  ;;  %230 = sbr.rel (%p227_p3) target bundleno = 726 (0x2d6), region = 36 }
   0xe   : > { %v752_v0 = vmov 0.0   ;;  %vm753_vm0 = vmmov 0   ;;  %s868_s16 = smov (!%p282_p5, %s738_s16), 1  ;;  %s870_s15 = smov (!%p284_p6, %s734_s15), 3  ;;  %vm325_vm1 = vcmask 261120   ;;  %vm406_vm3 = vcmask 64512  }
   0xf   : > { %656 = vmatprep.subr.mxu0 %v752_v0  ;;  %658 = vmatprep.mubr.msk.f32.mxu0 %vm753_vm0, %v752_v0  ;;  %s637_s22 = sshll.u32 %s868_s16, 2 }
  0x10   : > { %661 = vmatprep.subr.mxu1 %v752_v0  ;;  %663 = vmatprep.mubr.msk.f32.mxu1 %vm753_vm0, %v752_v0  ;;  %s287_s23 = sadd.s32 %s637_s22, %s870_s15 }
  0x11   : > { %s809_s24 = sshll.u32 %s287_s23, 3 }
  0x12   : > { %s297_s27 = scalar_lea.vmem %s853_s1, %s809_s24  ;;  %s289_s30 = scalar_lea.vmem %s852_s0, %s809_s24 }
  0x13   : > { %v323_v1 = vld [vmem:[%s297_s27] sm:$0xff]  ;;  %s313_s7 = scalar_lea.vmem %s855_s3, %s809_s24  ;;  %s305_s10 = scalar_lea.vmem %s854_s2, %s809_s24 }
  0x14   : > { %657 = vmatpush3.xpose.msk.msra.mxu0 %vm325_vm1, %v323_v1  ;;  %v322_v2 = vld [vmem:[%s289_s30] sm:$0xff]  ;;  %s321_s13 = scalar_lea.vmem %s856_s4, %s809_s24 }
  0x15   : > { %v403_v3 = vld [vmem:[%s313_s7] sm:$0xff] }
  0x16   : > { %vm404_vm2 = vcmp.eq.f32.partialorder %v403_v3, 0.0  ;;  %v324_v14 = vld [vmem:[%s305_s10] sm:$0xff] }
  0x17   : > { %659 = vmatmul.mubr.msk.f32.vlgmr.msra.gmra.mxu0 %vm325_vm1, %v322_v2  ;;  %662 = vmatpush3.msra.mxu1 %v324_v14 }
  0xd7   : > { %v398_v4 = vpop.f32.mrf.mxu0 }
  0xd8   : > { %v402_v5 = vmul.f32 0.17677669, %v398_v4 }
  0xd9   : > { %v660_v6 = vpop.f32.mrf.mxu0 }
  0xda   : > { %v405_v7 = vsel %vm404_vm2, -1e+09, %v402_v5 }
  0xdb   : > { %v407_v8 = vsel %vm406_vm3, %v405_v7, -inf }
  0xdc   : > { %408 = vmax.xlane.f32.xlu0 %v407_v8 }
 0x165   : > { %v409_v9 = vpop.xlane.xlu0 %408 }
 0x166   : > { %v410_v10 = vsub.f32 %v405_v7, %v409_v9 }
 0x168   : > { %v411_v11 = vmul.f32 1.442695, %v410_v10 }
 0x16a   : > { %708 = vpow2.f32 %v411_v11 }
 0x177   : > { %v709_v12 = vpop.eup %708 }
 0x178   : > { %v413_v13 = vsel %vm406_vm3, %v709_v12, 0.0 }
 0x179   : > { %414 = vadd.xlane.f32.xlu0 %v413_v13 }
 0x202   : > { %v415_v15 = vpop.xlane.xlu0 %414 }
 0x203   : > { %710 = vrcp.f32 %v415_v15 }
 0x210   : > { %v711_v16 = vpop.eup %710 }
 0x211   : > { %v417_v17 = vmul.f32 %v711_v16, %v709_v12 }
 0x213   : > { %664 = vmatmul.mubr.msk.f32.vlgmr.msra.gmra.mxu1 %vm406_vm3, %v417_v17 }
 0x2d3   : > { %v487_v18 = vpop.f32.mrf.mxu1 }
 0x2d4   : > { %491 = vst.msk [vmem:[%s321_s13] sm:$0xff] %vm325_vm1, %v487_v18 }
 0x2d5   : > { %v665_v19 = vpop.f32.mrf.mxu1 }
 0x2d6 PF: > { %s14_s19 = sadd.s32 1, %s750_s19   ;;  %s857_s15 = smov %s742_s17 }
 0x2d7   : > { %p11_p7 = scmp.ge.s32.totalorder %s14_s19, 10   ;;  %s858_s16 = smov %s746_s18 }
 0x2d8   : > { %s859_s17 = smov %s862_s20  ;;  %s860_s18 = smov %s866_s21 }
 0x2d9   :  { %13 = sbr.rel (!%p11_p7) target bundleno = 3 (0x3), region = 75 }

// kernel: decoder_block_forward.20
= control target key start
LH: loop header
LB: loop body
LE: loop exit
PB: predicated region body
PF: predicated region fallthrough
CT: control target
= control target key end

     0   :  { %s681_s15 = smov 0   ;;  %s683_s16 = smov 0   ;;  %s772_s0 = inlined_call_operand.vmem [shape: f32[16,128], index: 0, kind: input, shape index: {}]   ;;  %s773_s1 = inlined_call_operand.vmem [shape: f32[128,128], index: 1, kind: input, shape index: {}]   ;;  %s774_s2 = inlined_call_operand.vmem [shape: f32[1,128], index: 2, kind: input, shape index: {}]   ;;  %s775_s3 = inlined_call_operand.vmem [shape: f32[16,128], index: 3, kind: input, shape index: {}]   ;;  %s776_s4 = inlined_call_operand.vmem [shape: f32[16,128], index: 4, kind: output, shape index: {}]  }
   0x1   :  { %s685_s17 = smov 0  }
   0x2 LB: > { %s33_s18 = sadd.s32 1, %s648_s16  ;;  %p545_p0 = scmp.ge.s32.totalorder %s652_s17, 1  ;;  %s652_s17 = sphi %s685_s17, %s14_s17   ;;  %s648_s16 = sphi %s683_s16, %s778_s16   ;;  %s644_s15 = sphi %s681_s15, %s777_s15  }
   0x3   : > { %p35_p1 = scmp.ge.s32.totalorder %s33_s18, 2  ;;  %p225_p2 = scmp.lt.s32.totalorder %s652_s17, 3 }
   0x5   : > { %s780_s18 = smov (%p35_p1, %s33_s18), 0  ;;  %p226_p3 = pnand %p545_p0, %p225_p2 }
   0x6   : > { %p273_p4 = scmp.lt.s32.totalorder (!%p226_p3), %s644_s15, 1 }
   0x7   : > { %229 = sbr.rel (%p226_p3) target bundleno = 243 (0xf3), region = 36 }
   0xc   : > { %v328_v0 = vld [vmem:[%s773_s1 + $0x78] sm:$0xff]  ;;  %v654_v1 = vmov 0.0   ;;  %v327_v2 = vld [vmem:[%s773_s1 + $0x70] sm:$0xff]  ;;  %vm655_vm0 = vmmov 0   ;;  %v326_v3 = vld [vmem:[%s773_s1 + $0x68] sm:$0xff]  ;;  %s782_s15 = smov (!%p273_p4, %s644_s15), 1 }
   0xd   : > { %569 = vmatprep.subr.mxu0 %v654_v1  ;;  %601 = vmatprep.mubr.msk.f32.mxu0 %vm655_vm0, %v654_v1  ;;  %v325_v4 = vld [vmem:[%s773_s1 + $0x60] sm:$0xff]  ;;  %v324_v5 = vld [vmem:[%s773_s1 + $0x58] sm:$0xff]  ;;  %v323_v6 = vld [vmem:[%s773_s1 + $0x50] sm:$0xff]  ;;  %s546_s23 = sshll.u32 %s782_s15, 3 }
   0xe   : > { %570 = vmatpush3.msra.mxu0 %v328_v0  ;;  %v322_v7 = vld [vmem:[%s773_s1 + $0x48] sm:$0xff]  ;;  %v321_v8 = vld [vmem:[%s773_s1 + $0x40] sm:$0xff]  ;;  %v320_v9 = vld [vmem:[%s773_s1 + $0x38] sm:$0xff]  ;;  %s279_s30 = scalar_lea.vmem %s772_s0, %s546_s23  ;;  %s298_s8 = scalar_lea.vmem %s775_s3, %s546_s23 }
   0xf   : > { %571 = vmatprep.subr.mxu0 %v654_v1  ;;  %v319_v10 = vld [vmem:[%s773_s1 + $0x30] sm:$0xff]  ;;  %v318_v11 = vld [vmem:[%s773_s1 + $0x28] sm:$0xff]  ;;  %v317_v12 = vld [vmem:[%s773_s1 + $0x20] sm:$0xff]  ;;  %s305_s13 = scalar_lea.vmem %s776_s4, %s546_s23 }
  0x10   : > { %572 = vmatpush3.msra.mxu0 %v327_v2  ;;  %v316_v13 = vld [vmem:[%s773_s1 + $0x18] sm:$0xff]  ;;  %v315_v14 = vld [vmem:[%s773_s1 + $0x10] sm:$0xff]  ;;  %v314_v15 = vld [vmem:[%s773_s1 + $0x8] sm:$0xff] }
  0x11   : > { %573 = vmatprep.subr.mxu0 %v654_v1  ;;  %v313_v16 = vld [vmem:[%s773_s1] sm:$0xff] }
  0x12   : > { %574 = vmatpush3.msra.mxu0 %v326_v3  ;;  %v312_v17 = vld [vmem:[%s279_s30] sm:$0xff] }
  0x13   : > { %575 = vmatprep.subr.mxu0 %v654_v1  ;;  %v549_v18 = vld [vmem:[%s774_s2] ss:$0 sm:$0xff] }
  0x14   : > { %576 = vmatpush3.msra.mxu0 %v325_v4  ;;  %v413_v20 = vld [vmem:[%s298_s8] sm:$0xff] }
  0x15   : > { %577 = vmatprep.subr.mxu0 %v654_v1 }
  0x16   : > { %578 = vmatpush3.msra.mxu0 %v324_v5 }
  0x17   : > { %579 = vmatprep.subr.mxu0 %v654_v1 }
  0x18   : > { %580 = vmatpush3.msra.mxu0 %v323_v6 }
  0x19   : > { %581 = vmatprep.subr.mxu0 %v654_v1 }
  0x1a   : > { %582 = vmatpush3.msra.mxu0 %v322_v7 }
  0x1b   : > { %583 = vmatprep.subr.mxu0 %v654_v1 }
  0x1c   : > { %584 = vmatpush3.msra.mxu0 %v321_v8 }
  0x1d   : > { %585 = vmatprep.subr.mxu0 %v654_v1 }
  0x1e   : > { %586 = vmatpush3.msra.mxu0 %v320_v9 }
  0x1f   : > { %587 = vmatprep.subr.mxu0 %v654_v1 }
  0x20   : > { %588 = vmatpush3.msra.mxu0 %v319_v10 }
  0x21   : > { %589 = vmatprep.subr.mxu0 %v654_v1 }
  0x22   : > { %590 = vmatpush3.msra.mxu0 %v318_v11 }
  0x23   : > { %591 = vmatprep.subr.mxu0 %v654_v1 }
  0x24   : > { %592 = vmatpush3.msra.mxu0 %v317_v12 }
  0x25   : > { %593 = vmatprep.subr.mxu0 %v654_v1 }
  0x26   : > { %594 = vmatpush3.msra.mxu0 %v316_v13 }
  0x27   : > { %595 = vmatprep.subr.mxu0 %v654_v1 }
  0x28   : > { %596 = vmatpush3.msra.mxu0 %v315_v14 }
  0x29   : > { %597 = vmatprep.subr.mxu0 %v654_v1 }
  0x2a   : > { %598 = vmatpush3.msra.mxu0 %v314_v15 }
  0x2b   : > { %599 = vmatprep.subr.mxu0 %v654_v1 }
  0x2c   : > { %600 = vmatpush3.msra.mxu0 %v313_v16 }
  0x2d   : > { %602 = vmatmul.mubr.f32.vlgmr.msra.gmra.mxu0 %v312_v17 }
  0xed   : > { %v395_v19 = vpop.f32.mrf.mxu0 }
  0xee   : > { %v412_v21 = vadd.f32 %v549_v18, %v395_v19 }
  0xef   : > { %v603_v22 = vpop.f32.mrf.mxu0 }
  0xf0   : > { %v414_v23 = vadd.f32 %v413_v20, %v412_v21 }
  0xf2   : > { %415 = vst [vmem:[%s305_s13] sm:$0xff] %v414_v23 }
  0xf3 PF: > { %s14_s17 = sadd.s32 1, %s652_s17   ;;  %s777_s15 = smov %s648_s16 }
  0xf4   : > { %p11_p5 = scmp.ge.s32.totalorder %s14_s17, 4   ;;  %s778_s16 = smov %s780_s18 }
  0xf6   :  { %13 = sbr.rel (!%p11_p5) target bundleno = 2 (0x2), region = 83 }

// kernel: decoder_block_forward.29
= control target key start
LH: loop header
LB: loop body
LE: loop exit
PB: predicated region body
PF: predicated region fallthrough
CT: control target
= control target key end

     0   :  { %9 = vsyncpa [#allocation4], 0  ;;  %s992_s0 = inlined_call_operand.vmem [shape: f32[16,256], index: 0, kind: input, shape index: {}]   ;;  %s993_s1 = inlined_call_operand.vmem [shape: f32[256,128], index: 1, kind: input, shape index: {}]   ;;  %s994_s2 = inlined_call_operand.vmem [shape: f32[1,128], index: 2, kind: input, shape index: {}]   ;;  %s995_s3 = inlined_call_operand.vmem [shape: f32[16,128], index: 3, kind: input, shape index: {}]   ;;  %s996_s4 = inlined_call_operand.hbm [shape: f32[16,128], index: 4, kind: output, shape index: {}]  }
   0x1   :  { %11 = vsyncpa [#allocation4 + $0x1], 0  ;;  %s783_s15 = smov 0   ;;  %s785_s16 = smov 0  }
   0x2   :  { %s787_s17 = smov 0   ;;  %s789_s18 = smov 0  }
   0x3   :  { %s791_s19 = smov 0   ;;  %s793_s20 = smov 0  }
   0x4 LB: > { %s572_s21 = sadd.s32 4294967295, %s755_s20   ;;  %s573_s22 = sadd.s32 4294967294, %s755_s20   ;;  %s755_s20 = sphi %s793_s20, %s17_s20   ;;  %s751_s19 = sphi %s791_s19, %s1003_s19   ;;  %s747_s18 = sphi %s789_s18, %s1002_s18   ;;  %s743_s17 = sphi %s787_s17, %s1001_s17   ;;  %s739_s16 = sphi %s785_s16, %s1000_s16   ;;  %s735_s15 = sphi %s783_s15, %s999_s15  }
   0x5   : > { %s36_s23 = sadd.s32 1, %s751_s19  ;;  %s155_s24 = sadd.s32 1, %s743_s17 }
   0x6   : > { %p38_p0 = scmp.ge.s32.totalorder %s36_s23, 2  ;;  %p165_p1 = scmp.ne.s32.totalorder %s743_s17, %s739_s16 }
   0x7   : > { %p166_p2 = scmp.eq.s32.totalorder %s572_s21, 1  ;;  %p171_p3 = scmp.ne.s32.totalorder %s739_s16, %s735_s15 }
   0x8   : > { %s1005_s23 = smov (%p38_p0, %s36_s23), 0  ;;  %p172_p5 = scmp.eq.s32.totalorder %s573_s22, 1 }
   0x9   : > { %p823_p4 = por %p166_p2, %p165_p1  ;;  %s150_s26 = ssub.s32 %s751_s19, %s1005_s23 }
   0xa   : > { %p578_p6 = scmp.ge.s32.totalorder %s755_s20, 1  ;;  %p153_p7 = scmp.eq.s32.totalorder %s150_s26, 0 }
   0xb   : > { %p830_p8 = por %p172_p5, %p171_p3  ;;  %p231_p9 = scmp.lt.s32.totalorder %s755_s20, 3 }
   0xc   : > { %s836_s28 = scalar_select %p153_p7, %s743_s17, %s155_s24  }
   0xd   : > { %p232_p10 = pnand %p578_p6, %p231_p9 }
   0xe   : > { %p280_p11 = scmp.lt.s32.totalorder (!%p232_p10), %s747_s18, 1  ;;  %s276_s21 = sand.u32 (!%p232_p10), 1, %s739_s16  }
   0xf   : > { %235 = sbr.rel (%p232_p10) target bundleno = 267 (0x10b), region = 36  ;;  %s579_s24 = sshll.u32 (!%p232_p10), %s276_s21, 3 }
  0x10   : > { %s278_s7 = scalar_lea.vmem (!%p232_p10), [#allocation3], %s579_s24  ;;  %s436_s12 = scalar_lea.sflag (!%p232_p10), [#allocation4], %s276_s21 }
  0x11   : > { %s450_s8 = sshll.u32 (!%p232_p10), %s278_s7, 4  ;;  %s451_s8 = int_to_ptr.vmem [resolvable:$true] %s450_s8 }
  0x12   : > { %s679_s14 = scalar_lea.vmem (!%p232_p10), %s451_s8, 128 }
  0x13   : > { %p680_p12 = scmp.ne.s32.totalorder (!%p232_p10), %s451_s8, %s679_s14 }
  0x14   : > { %v347_v0 = vld [vmem:[%s993_s1 + $0xf8] sm:$0xff]  ;;  %v346_v2 = vld [vmem:[%s993_s1 + $0xf0] sm:$0xff]  ;;  %v345_v4 = vld [vmem:[%s993_s1 + $0xe8] sm:$0xff]  ;;  %s855_s13 = scalar_select %p280_p11, %s747_s18, 1 }
  0x15   : > { %v331_v1 = vld [vmem:[%s993_s1 + $0x78] sm:$0xff]  ;;  %589 = vmatprep.subr.mxu0 %v347_v0  ;;  %v330_v3 = vld [vmem:[%s993_s1 + $0x70] sm:$0xff]  ;;  %v329_v5 = vld [vmem:[%s993_s1 + $0x68] sm:$0xff]  ;;  %p681_p13 = pnand %p680_p12, %p823_p4 }
  0x16   : > { %590 = vmatpush3.msra.mxu0 %v331_v1  ;;  %v344_v6 = vld [vmem:[%s993_s1 + $0xe0] sm:$0xff]  ;;  %s588_s26 = sshll.u32 %s855_s13, 4  ;;  %v343_v8 = vld [vmem:[%s993_s1 + $0xd8] sm:$0xff]  ;;  %v342_v10 = vld [vmem:[%s993_s1 + $0xd0] sm:$0xff]  ;;  %s582_s22 = sshll.u32 %s855_s13, 3 }
  0x17   : > { %591 = vmatprep.subr.mxu0 %v346_v2  ;;  %v328_v7 = vld [vmem:[%s993_s1 + $0x60] sm:$0xff]  ;;  %v327_v9 = vld [vmem:[%s993_s1 + $0x58] sm:$0xff]  ;;  %s876_s11 = scalar_lea.vmem %s992_s0, %s588_s26  ;;  %v326_v11 = vld [vmem:[%s993_s1 + $0x50] sm:$0xff]  ;;  %s307_s30 = scalar_lea.vmem %s995_s3, %s582_s22 }
  0x18   : > { %592 = vmatpush3.msra.mxu0 %v330_v3  ;;  %v341_v12 = vld [vmem:[%s993_s1 + $0xc8] sm:$0xff]  ;;  %v340_v15 = vld [vmem:[%s993_s1 + $0xc0] sm:$0xff]  ;;  %v339_v17 = vld [vmem:[%s993_s1 + $0xb8] sm:$0xff]  ;;  %p682_p0 = pneg %p681_p13  ;;  %s757_s22 = smov [#allocation3]  }
  0x19   : > { %593 = vmatprep.subr.mxu0 %v345_v4  ;;  %v315_v13 = vld [vmem:[%s876_s11 + $0x8] sm:$0xff]  ;;  %v324_v16 = vld [vmem:[%s993_s1 + $0x40] sm:$0xff]  ;;  %v323_v18 = vld [vmem:[%s993_s1 + $0x38] sm:$0xff]  ;;  %s683_s29 = sshll.u32 %s757_s22, 4  ;;  %s684_s29 = int_to_ptr.vmem [resolvable:$false] %s683_s29 }
  0x1a   : > { %594 = vmatpush3.msra.mxu0 %v329_v5  ;;  %v325_v14 = vld [vmem:[%s993_s1 + $0x48] sm:$0xff]  ;;  %412 = vmatprep.mubr.f32.mxu0 %v315_v13  ;;  %v338_v19 = vld [vmem:[%s993_s1 + $0xb0] sm:$0xff]  ;;  %v336_v23 = vld [vmem:[%s993_s1 + $0xa0] sm:$0xff]  ;;  %p686_p1 = scmp.lt.s32.totalorder %s451_s8, %s684_s29 }
  0x1b   : > { %595 = vmatprep.subr.mxu0 %v344_v6  ;;  %v322_v20 = vld [vmem:[%s993_s1 + $0x30] sm:$0xff]  ;;  %v337_v21 = vld [vmem:[%s993_s1 + $0xa8] sm:$0xff]  ;;  %v320_v24 = vld [vmem:[%s993_s1 + $0x20] sm:$0xff] }
  0x1c   : > { %596 = vmatpush3.msra.mxu0 %v328_v7  ;;  %v321_v22 = vld [vmem:[%s993_s1 + $0x28] sm:$0xff]  ;;  %v335_v25 = vld [vmem:[%s993_s1 + $0x98] sm:$0xff]  ;;  %v334_v27 = vld [vmem:[%s993_s1 + $0x90] sm:$0xff] }
  0x1d   : > { %597 = vmatprep.subr.mxu0 %v343_v8  ;;  %v319_v26 = vld [vmem:[%s993_s1 + $0x18] sm:$0xff]  ;;  %v318_v28 = vld [vmem:[%s993_s1 + $0x10] sm:$0xff]  ;;  %v333_v29 = vld [vmem:[%s993_s1 + $0x88] sm:$0xff] }
  0x1e   : > { %598 = vmatpush3.msra.mxu0 %v327_v9  ;;  %v317_v30 = vld [vmem:[%s993_s1 + $0x8] sm:$0xff]  ;;  %v332_v31 = vld [vmem:[%s993_s1 + $0x80] sm:$0xff] }
  0x1f   : > { %599 = vmatprep.subr.mxu0 %v342_v10  ;;  %v316_v32 = vld [vmem:[%s993_s1] sm:$0xff] }
  0x20   : > { %600 = vmatpush3.msra.mxu0 %v326_v11  ;;  %v314_v33 = vld [vmem:[%s876_s11] sm:$0xff]  ;;  %s585_s11 = sshll.u32 %s747_s18, 7  ;;  %s685_s18 = scalar_lea.vmem %s684_s29, 256 }
  0x21   : > { %601 = vmatprep.subr.mxu0 %v341_v12  ;;  %v583_v36 = vld [vmem:[%s994_s2] ss:$0 sm:$0xff]  ;;  %s448_s10 = scalar_lea.hbm %s996_s4, %s585_s11  ;;  %p687_p2 = scmp.lt.s32.totalorder %s685_s18, %s679_s14 }
  0x22   : > { %602 = vmatpush3.msra.mxu0 %v325_v14  ;;  %v432_v38 = vld [vmem:[%s307_s30] sm:$0xff] }
  0x23   : > { %603 = vmatprep.subr.mxu0 %v340_v15  ;;  %p688_p3 = por %p687_p2, %p686_p1 }
  0x24   : > { %604 = vmatpush3.msra.mxu0 %v324_v16 }
  0x25   : > { %605 = vmatprep.subr.mxu0 %v339_v17  ;;  %p689_p5 = pnand %p688_p3, %p682_p0 }
  0x26   : > { %606 = vmatpush3.msra.mxu0 %v323_v18 }
  0x27   : > { %607 = vmatprep.subr.mxu0 %v338_v19 }
  0x28   : > { %608 = vmatpush3.msra.mxu0 %v322_v20 }
  0x29   : > { %609 = vmatprep.subr.mxu0 %v337_v21 }
  0x2a   : > { %610 = vmatpush3.msra.mxu0 %v321_v22 }
  0x2b   : > { %611 = vmatprep.subr.mxu0 %v336_v23 }
  0x2c   : > { %612 = vmatpush3.msra.mxu0 %v320_v24 }
  0x2d   : > { %613 = vmatprep.subr.mxu0 %v335_v25 }
  0x2e   : > { %614 = vmatpush3.msra.mxu0 %v319_v26 }
  0x2f   : > { %615 = vmatprep.subr.mxu0 %v334_v27 }
  0x30   : > { %616 = vmatpush3.msra.mxu0 %v318_v28 }
  0x31   : > { %617 = vmatprep.subr.mxu0 %v333_v29 }
  0x32   : > { %618 = vmatpush3.msra.mxu0 %v317_v30 }
  0x33   : > { %619 = vmatprep.subr.mxu0 %v332_v31 }
  0x34   : > { %620 = vmatpush3.msra.mxu0 %v316_v32 }
  0x35   : > { %413 = vmatmul.mubr.f32.vlgmr.msra.gmra.mxu0 %v314_v33 }
  0xf5   : > { %v621_v34 = vpop.f32.mrf.mxu0 }
  0xf7   : > { %v622_v35 = vpop.f32.mrf.mxu0 }
  0xf8   : > { %v623_v37 = vadd.f32 %v622_v35, %v621_v34 }
  0xfa   : > { %v431_v39 = vadd.f32 %v623_v37, %v583_v36 }
  0xfc   : > { %v433_v40 = vadd.f32 %v432_v38, %v431_v39 }
  0xfe   : > { %434 = vst [vmem:[%s278_s7] sm:$0xff] %v433_v40 }
  0xff   : > { %692 = shalt.err (!%p689_p5)
}
 0x100   : > { %s693_s24 = scalar_lea.hbm %s448_s10, 128  ;;  %s697_s30 = scalar_lea.hbm %s996_s4, 256 }
 0x101   : > { %p694_p6 = scmp.ne.s32.totalorder %s448_s10, %s693_s24  ;;  %p698_p10 = scmp.lt.s32.totalorder %s448_s10, %s996_s4 }
 0x102   : > { %p699_p11 = scmp.lt.s32.totalorder %s697_s30, %s693_s24 }
 0x103   : > { %p695_p7 = pnand %p694_p6, %p823_p4 }
 0x104   : > { %p700_p12 = por %p699_p11, %p698_p10 }
 0x105   : > { %p696_p9 = pneg %p695_p7 }
 0x107   : > { %p701_p13 = pnand %p700_p12, %p696_p9 }
 0x109   : > { %704 = shalt.err (!%p701_p13)
}
 0x10a   : > { %624 = dma.vmem_to_hbm [thread:$0]  (%p823_p4), %s451_s8, 128, %s448_s10, %s436_s12  }
 0x10b PF: > { %p630_p0 = scmp.ge.s32.totalorder %s755_s20, 2  ;;  %s462_s11 = sand.u32 1, %s735_s15  }
 0x10c   : > { %s463_s7 = scalar_lea.sflag [#allocation4], %s462_s11 }
 0x10d   : > { %p627_p1 = pnand %p630_p0, %p830_p8 }
 0x10f   : > { %p628_p2 = pneg %p627_p1 }
 0x111   : > { %730 = dma.done.wait (%p628_p2), %s463_s7, 128  }
 0x112   : > { %732 = vsyncadd (%p628_p2), %s463_s7, 4294967168  ;;  %s17_s20 = sadd.s32 1, %s755_s20   ;;  %s999_s15 = smov %s739_s16 }
 0x113   : > { %p14_p3 = scmp.ge.s32.totalorder %s17_s20, 4   ;;  %s1000_s16 = smov %s743_s17 }
 0x114   : > { %s1001_s17 = smov %s836_s28  ;;  %s1002_s18 = smov %s751_s19 }
 0x115   : > { %s1003_s19 = smov %s1005_s23  ;;  %16 = sbr.rel (!%p14_p3) target bundleno = 4 (0x4), region = 88 }
 0x11a   :  { %468 = vsyncpa [#allocation4], 1 }
 0x11b   :  { %470 = vsyncpa [#allocation4 + $0x1], 1 }

// kernel: decoder_block_forward.28
= control target key start
LH: loop header
LB: loop body
LE: loop exit
PB: predicated region body
PF: predicated region fallthrough
CT: control target
= control target key end

     0   :  { %s611_s12 = smov 0   ;;  %s613_s13 = smov 0   ;;  %s751_s0 = inlined_call_operand.vmem [shape: f32[16,128], index: 0, kind: input, shape index: {}]   ;;  %s752_s1 = inlined_call_operand.vmem [shape: f32[128,256], index: 1, kind: input, shape index: {}]   ;;  %s753_s2 = inlined_call_operand.vmem [shape: f32[1,256], index: 2, kind: input, shape index: {}]   ;;  %s754_s3 = inlined_call_operand.vmem [shape: f32[16,256], index: 3, kind: output, shape index: {}]  }
   0x1   :  { %s615_s14 = smov 0  }
   0x2 LB: > { %s32_s15 = sadd.s32 1, %s584_s13  ;;  %p534_p0 = scmp.ge.s32.totalorder %s588_s14, 1  ;;  %s588_s14 = sphi %s615_s14, %s13_s14   ;;  %s584_s13 = sphi %s613_s13, %s756_s13   ;;  %s580_s12 = sphi %s611_s12, %s755_s12  }
   0x3   : > { %p34_p1 = scmp.ge.s32.totalorder %s32_s15, 2  ;;  %p191_p2 = scmp.lt.s32.totalorder %s588_s14, 3 }
   0x5   : > { %s758_s15 = smov (%p34_p1, %s32_s15), 0  ;;  %p192_p3 = pnand %p534_p0, %p191_p2 }
   0x6   : > { %p235_p4 = scmp.lt.s32.totalorder (!%p192_p3), %s580_s12, 1 }
   0x7   : > { %195 = sbr.rel (%p192_p3) target bundleno = 245 (0xf5), region = 32 }
   0xc   : > { %v309_v0 = vld [vmem:[%s752_s1 + $0xf8] sm:$0xff]  ;;  %v308_v1 = vld [vmem:[%s752_s1 + $0xf0] sm:$0xff]  ;;  %v307_v2 = vld [vmem:[%s752_s1 + $0xe8] sm:$0xff]  ;;  %v590_v4 = vmov 0.0   ;;  %s760_s12 = smov (!%p235_p4, %s580_s12), 1  ;;  %v392_v34 = vlaneseq }
   0xd   : > { %310 = vmatprep.subr.mxu0 %v309_v0  ;;  %v306_v3 = vld [vmem:[%s752_s1 + $0xe0] sm:$0xff]  ;;  %374 = vmatprep.mubr.f32.mxu0 %v590_v4  ;;  %v305_v5 = vld [vmem:[%s752_s1 + $0xd8] sm:$0xff]  ;;  %v304_v6 = vld [vmem:[%s752_s1 + $0xd0] sm:$0xff]  ;;  %s535_s24 = sshll.u32 %s760_s12, 3  ;;  %s540_s17 = sshll.u32 %s760_s12, 4 }
   0xe   : > { %311 = vmatpush1.msra.mxu0 %v308_v1  ;;  %v303_v7 = vld [vmem:[%s752_s1 + $0xc8] sm:$0xff]  ;;  %v302_v8 = vld [vmem:[%s752_s1 + $0xc0] sm:$0xff]  ;;  %v301_v9 = vld [vmem:[%s752_s1 + $0xb8] sm:$0xff]  ;;  %s241_s6 = scalar_lea.vmem %s751_s0, %s535_s24  ;;  %v393_v35 = vshrl.u32 %v392_v34, 7  ;;  %s267_s20 = scalar_lea.vmem %s754_s3, %s540_s17 }
   0xf   : > { %312 = vmatprep.subr.mxu0 %v307_v2  ;;  %v300_v10 = vld [vmem:[%s752_s1 + $0xb0] sm:$0xff]  ;;  %v299_v11 = vld [vmem:[%s752_s1 + $0xa8] sm:$0xff]  ;;  %v298_v12 = vld [vmem:[%s752_s1 + $0xa0] sm:$0xff] }
  0x10   : > { %313 = vmatpush1.msra.mxu0 %v306_v3  ;;  %v297_v13 = vld [vmem:[%s752_s1 + $0x98] sm:$0xff]  ;;  %v296_v14 = vld [vmem:[%s752_s1 + $0x90] sm:$0xff]  ;;  %v295_v15 = vld [vmem:[%s752_s1 + $0x88] sm:$0xff]  ;;  %v394_v36 = vsub.s32 0, %v393_v35  ;;  %v398_v38 = vsub.s32 1, %v393_v35 }
  0x11   : > { %314 = vmatprep.subr.mxu0 %v305_v5  ;;  %v294_v16 = vld [vmem:[%s752_s1 + $0x80] sm:$0xff]  ;;  %v293_v17 = vld [vmem:[%s752_s1 + $0x78] sm:$0xff]  ;;  %v292_v18 = vld [vmem:[%s752_s1 + $0x70] sm:$0xff] }
  0x12   : > { %315 = vmatpush1.msra.mxu0 %v304_v6  ;;  %v291_v19 = vld [vmem:[%s752_s1 + $0x68] sm:$0xff]  ;;  %v290_v20 = vld [vmem:[%s752_s1 + $0x60] sm:$0xff]  ;;  %v289_v21 = vld [vmem:[%s752_s1 + $0x58] sm:$0xff] }
  0x13   : > { %316 = vmatprep.subr.mxu0 %v303_v7  ;;  %v288_v22 = vld [vmem:[%s752_s1 + $0x50] sm:$0xff]  ;;  %v287_v23 = vld [vmem:[%s752_s1 + $0x48] sm:$0xff]  ;;  %v286_v24 = vld [vmem:[%s752_s1 + $0x40] sm:$0xff] }
  0x14   : > { %317 = vmatpush1.msra.mxu0 %v302_v8  ;;  %v285_v25 = vld [vmem:[%s752_s1 + $0x38] sm:$0xff]  ;;  %v284_v26 = vld [vmem:[%s752_s1 + $0x30] sm:$0xff]  ;;  %v283_v27 = vld [vmem:[%s752_s1 + $0x28] sm:$0xff] }
  0x15   : > { %318 = vmatprep.subr.mxu0 %v301_v9  ;;  %v282_v28 = vld [vmem:[%s752_s1 + $0x20] sm:$0xff]  ;;  %v281_v29 = vld [vmem:[%s752_s1 + $0x18] sm:$0xff]  ;;  %v280_v30 = vld [vmem:[%s752_s1 + $0x10] sm:$0xff] }
  0x16   : > { %319 = vmatpush1.msra.mxu0 %v300_v10  ;;  %v279_v31 = vld [vmem:[%s752_s1 + $0x8] sm:$0xff]  ;;  %v278_v32 = vld [vmem:[%s752_s1] sm:$0xff] }
  0x17   : > { %320 = vmatprep.subr.mxu0 %v299_v11  ;;  %v277_v33 = vld [vmem:[%s241_s6] sm:$0xff] }
  0x18   : > { %321 = vmatpush1.msra.mxu0 %v298_v12  ;;  %v390_v37 = vld [vmem:[%s753_s2] sm:$0x3] }
  0x19   : > { %322 = vmatprep.subr.mxu0 %v297_v13  ;;  %v395_v39 = vrot.slane %v390_v37, %v394_v36  ;;  %v399_v40 = vrot.slane %v390_v37, %v398_v38 }
  0x1a   : > { %323 = vmatpush1.msra.mxu0 %v296_v14 }
  0x1b   : > { %324 = vmatprep.subr.mxu0 %v295_v15 }
  0x1c   : > { %325 = vmatpush1.msra.mxu0 %v294_v16 }
  0x1d   : > { %326 = vmatprep.subr.mxu0 %v293_v17 }
  0x1e   : > { %327 = vmatpush1.msra.mxu0 %v292_v18 }
  0x1f   : > { %328 = vmatprep.subr.mxu0 %v291_v19 }
  0x20   : > { %329 = vmatpush1.msra.mxu0 %v290_v20 }
  0x21   : > { %330 = vmatprep.subr.mxu0 %v289_v21 }
  0x22   : > { %331 = vmatpush1.msra.mxu0 %v288_v22 }
  0x23   : > { %332 = vmatprep.subr.mxu0 %v287_v23 }
  0x24   : > { %333 = vmatpush1.msra.mxu0 %v286_v24 }
  0x25   : > { %334 = vmatprep.subr.mxu0 %v285_v25 }
  0x26   : > { %335 = vmatpush1.msra.mxu0 %v284_v26 }
  0x27   : > { %336 = vmatprep.subr.mxu0 %v283_v27 }
  0x28   : > { %337 = vmatpush1.msra.mxu0 %v282_v28 }
  0x29   : > { %338 = vmatprep.subr.mxu0 %v281_v29 }
  0x2a   : > { %339 = vmatpush1.msra.mxu0 %v280_v30 }
  0x2b   : > { %340 = vmatprep.subr.mxu0 %v279_v31 }
  0x2c   : > { %341 = vmatpush1.msra.mxu0 %v278_v32 }
  0x2d   : > { %375 = vmatmul.mubr.f32.vlgmr.msra.gmra.mxu0 %v277_v33 }
  0xed   : > { %v376_v41 = vpop.f32.mrf.mxu0 }
  0xee   : > { %v402_v42 = vadd.f32 %v395_v39, %v376_v41 }
  0xef   : > { %v378_v43 = vpop.f32.mrf.mxu0 }
  0xf0   : > { %v404_v44 = vmax.f32 %v402_v42, 0.0  ;;  %v403_v45 = vadd.f32 %v399_v40, %v378_v43 }
  0xf2   : > { %406 = vst [vmem:[%s267_s20] sm:$0xff] %v404_v44  ;;  %v405_v46 = vmax.f32 %v403_v45, 0.0 }
  0xf4   : > { %407 = vst [vmem:[%s267_s20 + $0x8] sm:$0xff] %v405_v46 }
  0xf5 PF: > { %s13_s14 = sadd.s32 1, %s588_s14   ;;  %s755_s12 = smov %s584_s13 }
  0xf6   : > { %p10_p5 = scmp.ge.s32.totalorder %s13_s14, 4   ;;  %s756_s13 = smov %s758_s15 }
  0xf8   :  { %12 = sbr.rel (!%p10_p5) target bundleno = 2 (0x2), region = 76 }

</bundles_post_ra>
